<compile_context>
chip_gen: v5e
topology: v5e:2x2
jax: 0.10.0
libtpu: 0.0.40
codegen_flags: <defaults>
</compile_context>

<pallas_src>
import functools

import numpy as np
import jax
import jax.numpy as jnp
from jax import lax
from jax.experimental import pallas as pl
from jax.experimental.pallas import tpu as pltpu

POOL_H = 5
POOL_W = 5
SPATIAL_SCALE = 1.0
SAMPLING_RATIO = 2  # fixed (>0) so the sample grid is static


def _round_up(v, m):
    return (v + m - 1) // m * m


def _roi_align_kernel(bidx_ref, boxes_ref, phb_ref, pwb_ref, hpix_ref,
                      wpix_ref, feat_ref, out_ref, *,
                      pool_h, pool_w, sampling, scale, height, width):
    k = pl.program_id(0)
    x1 = boxes_ref[0, k] * scale
    y1 = boxes_ref[1, k] * scale
    x2 = boxes_ref[2, k] * scale
    y2 = boxes_ref[3, k] * scale
    roi_w = jnp.maximum(x2 - x1, 1.0)   # aligned=False semantics
    roi_h = jnp.maximum(y2 - y1, 1.0)
    bin_h = roi_h / pool_h
    bin_w = roi_w / pool_w

    ph = phb_ref[...]    # (PH*PW, 1)  bin-row index of each output row
    pw = pwb_ref[...]    # (PH*PW, 1)  bin-col index of each output row
    hp = hpix_ref[...]   # (1, H*W)    pixel y of each flattened feature column
    wp = wpix_ref[...]   # (1, H*W)    pixel x of each flattened feature column

    def axis_weights(start, bin_size, bin_idx, pix, n_pix):
        # Sum over the `sampling` sample points of the 1-D bilinear hat
        # weights; (PH*PW, 1) op (1, H*W) broadcasts to (PH*PW, H*W).
        w = jnp.zeros((bin_idx.shape[0], pix.shape[1]), jnp.float32)
        for s in range(sampling):
            coord = start + bin_idx * bin_size + (s + 0.5) * bin_size / sampling
            valid = jnp.logical_and(coord >= -1.0,
                                    coord <= float(n_pix)).astype(jnp.float32)
            c = jnp.clip(coord, 0.0, float(n_pix - 1))
            w = w + valid * jnp.maximum(1.0 - jnp.abs(c - pix), 0.0)
        return w

    wy = axis_weights(y1, bin_h, ph, hp, height)   # (PH*PW, H*W)
    wx = axis_weights(x1, bin_w, pw, wp, width)    # (PH*PW, H*W)
    wxy = (wy * wx) * (1.0 / float(sampling * sampling))

    # Single MXU matmul per roi: contraction over H*W, C on the lane axis.
    out_ref[0] = jnp.dot(wxy, feat_ref[0],
                         preferred_element_type=jnp.float32,
                         precision=lax.Precision.HIGHEST)
    # TODO(synk): lax.Precision.HIGH is a ~2x MXU lever once rois are batched
    # and the kernel becomes MXU-bound; re-validate the 1e-4 tolerance first.


@functools.partial(jax.jit,
                   static_argnames=("pool_h", "pool_w", "sampling", "scale"))
def roi_align_pallas(feat, rois, pool_h=POOL_H, pool_w=POOL_W,
                     sampling=SAMPLING_RATIO, scale=SPATIAL_SCALE):
    n, c, h, w = feat.shape
    k = rois.shape[0]
    hw = h * w
    phpw = pool_h * pool_w

    # Lane-dense feature layout: channels on the last (lane) axis.
    feat_l = jnp.transpose(feat, (0, 2, 3, 1)).reshape(n, hw, c)

    # Clamp batch indices (they feed an HBM DMA index_map with no HW bounds
    # check) and sort rois by image so consecutive grid steps reuse the
    # already-DMA'd feature block.
    batch_idx = jnp.clip(rois[:, 0].astype(jnp.int32), 0, n - 1)
    order = jnp.argsort(batch_idx)
    inv_order = jnp.argsort(order)
    batch_sorted = batch_idx[order]
    rois_sorted = rois[order]
    boxes_sorted = rois_sorted[:, 1:5].astype(jnp.float32).T   # (4, K) for SMEM

    # Static index helpers (built at trace time with numpy).
    ph_col = jnp.asarray(
        np.repeat(np.arange(pool_h, dtype=np.float32), pool_w).reshape(phpw, 1))
    pw_col = jnp.asarray(
        np.tile(np.arange(pool_w, dtype=np.float32), pool_h).reshape(phpw, 1))
    h_row = jnp.asarray(
        np.repeat(np.arange(h, dtype=np.float32), w).reshape(1, hw))
    w_row = jnp.asarray(
        np.tile(np.arange(w, dtype=np.float32), h).reshape(1, hw))

    kernel = functools.partial(
        _roi_align_kernel, pool_h=pool_h, pool_w=pool_w, sampling=sampling,
        scale=scale, height=h, width=w)

    grid_spec = pltpu.PrefetchScalarGridSpec(
        num_scalar_prefetch=1,            # batch indices -> SMEM, feed index_map
        grid=(k,),
        in_specs=[
            # roi box coordinates: whole (4, K) array resident in SMEM
            pl.BlockSpec(memory_space=pltpu.MemorySpace.SMEM),
            # static index helpers (same block every step -> DMA'd once)
            pl.BlockSpec((phpw, 1), lambda i, b: (0, 0)),
            pl.BlockSpec((phpw, 1), lambda i, b: (0, 0)),
            pl.BlockSpec((1, hw), lambda i, b: (0, 0)),
            pl.BlockSpec((1, hw), lambda i, b: (0, 0)),
            # feature map: DMA only the image this roi refers to (block index
            # repeats for sorted rois -> Pallas skips the redundant DMA)
            pl.BlockSpec((1, hw, c), lambda i, b: (b[i], 0, 0)),
        ],
        out_specs=pl.BlockSpec((1, phpw, c), lambda i, b: (i, 0, 0)),
    )

    # VMEM budget: double-buffered blocks + weight intermediates + headroom.
    feat_blk = _round_up(hw, 8) * _round_up(c, 128) * 4
    out_blk = _round_up(phpw, 8) * _round_up(c, 128) * 4
    aux_blk = (2 * _round_up(phpw, 8) * 128 + 2 * 8 * _round_up(hw, 128)) * 4
    wgt_blk = 3 * _round_up(phpw, 8) * _round_up(hw, 128) * 4
    vmem_limit = int(min(2 * (feat_blk + out_blk + aux_blk) + wgt_blk
                         + (8 << 20), 100 << 20))

    out_l = pl.pallas_call(
        kernel,
        out_shape=jax.ShapeDtypeStruct((k, phpw, c), jnp.float32),
        grid_spec=grid_spec,
        compiler_params=pltpu.CompilerParams(
            dimension_semantics=("parallel",),   # rois are independent
            vmem_limit_bytes=vmem_limit),
    )(batch_sorted, boxes_sorted, ph_col, pw_col, h_row, w_row, feat_l)

    # (K, PH*PW, C) -> torchvision NCHW (K, C, PH, PW), undo roi sorting.
    out_nchw = out_l.reshape(k, pool_h, pool_w, c).transpose(0, 3, 1, 2)
    return out_nchw[inv_order]


def roi_op_tester_module_wrapper_forward(a, b):
    """Equivalent of RoIOpTesterModuleWrapper.forward(a, b): runs the RoI op."""
    return roi_align_pallas(a, b)


def _roi_align_reference(feat, rois, pool_h, pool_w, sampling, scale):
    """Pure numpy reference (torchvision roi_align, aligned=False)."""
    feat = np.asarray(feat, np.float64)
    rois = np.asarray(rois, np.float64)
    n, c, h, w = feat.shape
    k = rois.shape[0]
    out = np.zeros((k, c, pool_h, pool_w))
    for r in range(k):
        b = int(rois[r, 0])
        rx1, ry1, rx2, ry2 = rois[r, 1:] * scale
        roi_w = max(rx2 - rx1, 1.0)
        roi_h = max(ry2 - ry1, 1.0)
        bin_h = roi_h / pool_h
        bin_w = roi_w / pool_w
        for ph in range(pool_h):
            for pw in range(pool_w):
                acc = np.zeros(c)
                for iy in range(sampling):
                    y = ry1 + ph * bin_h + (iy + 0.5) * bin_h / sampling
                    for ix in range(sampling):
                        x = rx1 + pw * bin_w + (ix + 0.5) * bin_w / sampling
                        if y < -1.0 or y > h or x < -1.0 or x > w:
                            continue
                        yy = min(max(y, 0.0), h - 1.0)
                        xx = min(max(x, 0.0), w - 1.0)
                        y0 = int(np.floor(yy)); x0 = int(np.floor(xx))
                        yh = min(y0 + 1, h - 1); xh = min(x0 + 1, w - 1)
                        ly = yy - y0; lx = xx - x0
                        acc += (feat[b, :, y0, x0] * (1 - ly) * (1 - lx)
                                + feat[b, :, y0, xh] * (1 - ly) * lx
                                + feat[b, :, yh, x0] * ly * (1 - lx)
                                + feat[b, :, yh, xh] * ly * lx)
                out[r, :, ph, pw] = acc / (sampling * sampling)
    return out


if __name__ == "__main__":
    key = jax.random.PRNGKey(0)
    N, C, H, W = 2, 4, 16, 16
    x = jax.random.normal(key, (N, C, H, W), dtype=jnp.float32)
    # rois intentionally NOT grouped by batch index to exercise the
    # sort / un-permute path.
    rois = jnp.array(
        [[0.0, 0.0, 0.0, 9.0, 9.0],
         [1.0, 4.0, 4.0, 15.0, 15.0],
         [0.0, 2.5, 3.5, 12.0, 14.0],
         [0.0, 1.0, 1.0, 8.0, 8.0]], dtype=jnp.float32)

    out = roi_op_tester_module_wrapper_forward(x, rois)
    jax.block_until_ready(out)

    ref = _roi_align_reference(x, rois, POOL_H, POOL_W,
                               SAMPLING_RATIO, SPATIAL_SCALE)
    np.testing.assert_allclose(np.asarray(out), ref, atol=1e-4, rtol=1e-4)
    print("KERNEL_OK")
</pallas_src>

<mosaic_0001>
module attributes {stable_mosaic.version = 11 : i64} {
  func.func @_roi_align_kernel(%arg0: i32, %arg1: memref<4xi32, #tpu.memory_space<smem>>, %arg2: memref<4x4xf32, #tpu.memory_space<smem>>, %arg3: memref<25x1xf32, #tpu.memory_space<vmem>>, %arg4: memref<25x1xf32, #tpu.memory_space<vmem>>, %arg5: memref<1x256xf32, #tpu.memory_space<vmem>>, %arg6: memref<1x256xf32, #tpu.memory_space<vmem>>, %arg7: memref<1x256x4xf32, #tpu.memory_space<vmem>>, %arg8: memref<1x25x4xf32, #tpu.memory_space<vmem>>) attributes {dimension_semantics = [#tpu.dimension_semantics<parallel>], iteration_bounds = array<i64: 4>, scalar_prefetch = 1 : i64, scratch_operands = 0 : i64, tpu.core_type = #tpu.core_type<tc>, window_params = [{transform_indices = @transform_0, window_bounds = array<i64: 4, 4>}, {pipeline_mode = #tpu.pipeline_mode<synchronous>, transform_indices = @transform_1, window_bounds = array<i64: 25, 1>}, {pipeline_mode = #tpu.pipeline_mode<synchronous>, transform_indices = @transform_2, window_bounds = array<i64: 25, 1>}, {pipeline_mode = #tpu.pipeline_mode<synchronous>, transform_indices = @transform_3, window_bounds = array<i64: 1, 256>}, {pipeline_mode = #tpu.pipeline_mode<synchronous>, transform_indices = @transform_4, window_bounds = array<i64: 1, 256>}, {transform_indices = @transform_5, window_bounds = array<i64: 1, 256, 4>}, {transform_indices = @transform_6, window_bounds = array<i64: 1, 25, 4>}]} {
    %c0 = arith.constant 0 : index
    %0 = arith.index_cast %arg0 : i32 to index
    %1 = memref.load %arg2[%c0, %0] : memref<4x4xf32, #tpu.memory_space<smem>>
    %cst = arith.constant 1.000000e+00 : f32
    %2 = arith.mulf %1, %cst : f32
    %c1 = arith.constant 1 : index
    %3 = arith.index_cast %arg0 : i32 to index
    %4 = memref.load %arg2[%c1, %3] : memref<4x4xf32, #tpu.memory_space<smem>>
    %cst_0 = arith.constant 1.000000e+00 : f32
    %5 = arith.mulf %4, %cst_0 : f32
    %c2 = arith.constant 2 : index
    %6 = arith.index_cast %arg0 : i32 to index
    %7 = memref.load %arg2[%c2, %6] : memref<4x4xf32, #tpu.memory_space<smem>>
    %cst_1 = arith.constant 1.000000e+00 : f32
    %8 = arith.mulf %7, %cst_1 : f32
    %c3 = arith.constant 3 : index
    %9 = arith.index_cast %arg0 : i32 to index
    %10 = memref.load %arg2[%c3, %9] : memref<4x4xf32, #tpu.memory_space<smem>>
    %cst_2 = arith.constant 1.000000e+00 : f32
    %11 = arith.mulf %10, %cst_2 : f32
    %12 = arith.subf %8, %2 : f32
    %cst_3 = arith.constant 1.000000e+00 : f32
    %13 = arith.maximumf %12, %cst_3 : f32
    %14 = arith.subf %11, %5 : f32
    %cst_4 = arith.constant 1.000000e+00 : f32
    %15 = arith.maximumf %14, %cst_4 : f32
    %cst_5 = arith.constant 5.000000e+00 : f32
    %16 = arith.divf %15, %cst_5 : f32
    %cst_6 = arith.constant 5.000000e+00 : f32
    %17 = arith.divf %13, %cst_6 : f32
    %c0_7 = arith.constant 0 : index
    %c0_8 = arith.constant 0 : index
    %18 = vector.load %arg3[%c0_7, %c0_8] : memref<25x1xf32, #tpu.memory_space<vmem>>, vector<25x1xf32>
    %c0_9 = arith.constant 0 : index
    %c0_10 = arith.constant 0 : index
    %19 = vector.load %arg4[%c0_9, %c0_10] : memref<25x1xf32, #tpu.memory_space<vmem>>, vector<25x1xf32>
    %c0_11 = arith.constant 0 : index
    %c0_12 = arith.constant 0 : index
    %20 = vector.load %arg5[%c0_11, %c0_12] : memref<1x256xf32, #tpu.memory_space<vmem>>, vector<1x256xf32>
    %c0_13 = arith.constant 0 : index
    %c0_14 = arith.constant 0 : index
    %21 = vector.load %arg6[%c0_13, %c0_14] : memref<1x256xf32, #tpu.memory_space<vmem>>, vector<1x256xf32>
    %cst_15 = arith.constant 0.000000e+00 : f32
    %22 = vector.broadcast %cst_15 : f32 to vector<25x256xf32>
    %23 = vector.broadcast %16 : f32 to vector<25x1xf32>
    %24 = arith.mulf %18, %23 : vector<25x1xf32>
    %25 = vector.broadcast %5 : f32 to vector<25x1xf32>
    %26 = arith.addf %25, %24 : vector<25x1xf32>
    %cst_16 = arith.constant 5.000000e-01 : f32
    %27 = arith.mulf %cst_16, %16 : f32
    %cst_17 = arith.constant 2.000000e+00 : f32
    %28 = arith.divf %27, %cst_17 : f32
    %29 = vector.broadcast %28 : f32 to vector<25x1xf32>
    %30 = arith.addf %26, %29 : vector<25x1xf32>
    %cst_18 = arith.constant -1.000000e+00 : f32
    %31 = vector.broadcast %cst_18 : f32 to vector<25x1xf32>
    %32 = arith.cmpf oge, %30, %31 : vector<25x1xf32>
    %cst_19 = arith.constant 1.600000e+01 : f32
    %33 = vector.broadcast %cst_19 : f32 to vector<25x1xf32>
    %34 = arith.cmpf ole, %30, %33 : vector<25x1xf32>
    %35 = arith.andi %32, %34 : vector<25x1xi1>
    %36 = arith.extui %35 : vector<25x1xi1> to vector<25x1xi32>
    %37 = arith.sitofp %36 : vector<25x1xi32> to vector<25x1xf32>
    %cst_20 = arith.constant 0.000000e+00 : f32
    %cst_21 = arith.constant 1.500000e+01 : f32
    %38 = vector.broadcast %cst_20 : f32 to vector<25x1xf32>
    %39 = arith.maximumf %38, %30 : vector<25x1xf32>
    %40 = vector.broadcast %cst_21 : f32 to vector<25x1xf32>
    %41 = arith.minimumf %40, %39 : vector<25x1xf32>
    %42 = vector.broadcast %41 : vector<25x1xf32> to vector<25x256xf32>
    %43 = vector.broadcast %20 : vector<1x256xf32> to vector<25x256xf32>
    %44 = arith.subf %42, %43 : vector<25x256xf32>
    %45 = math.absf %44 : vector<25x256xf32>
    %cst_22 = arith.constant 1.000000e+00 : f32
    %46 = vector.broadcast %cst_22 : f32 to vector<25x256xf32>
    %47 = arith.subf %46, %45 : vector<25x256xf32>
    %cst_23 = arith.constant 0.000000e+00 : f32
    %48 = vector.broadcast %cst_23 : f32 to vector<25x256xf32>
    %49 = arith.maximumf %47, %48 : vector<25x256xf32>
    %50 = vector.broadcast %37 : vector<25x1xf32> to vector<25x256xf32>
    %51 = arith.mulf %50, %49 : vector<25x256xf32>
    %52 = arith.addf %22, %51 : vector<25x256xf32>
    %53 = vector.broadcast %16 : f32 to vector<25x1xf32>
    %54 = arith.mulf %18, %53 : vector<25x1xf32>
    %55 = vector.broadcast %5 : f32 to vector<25x1xf32>
    %56 = arith.addf %55, %54 : vector<25x1xf32>
    %cst_24 = arith.constant 1.500000e+00 : f32
    %57 = arith.mulf %cst_24, %16 : f32
    %cst_25 = arith.constant 2.000000e+00 : f32
    %58 = arith.divf %57, %cst_25 : f32
    %59 = vector.broadcast %58 : f32 to vector<25x1xf32>
    %60 = arith.addf %56, %59 : vector<25x1xf32>
    %cst_26 = arith.constant -1.000000e+00 : f32
    %61 = vector.broadcast %cst_26 : f32 to vector<25x1xf32>
    %62 = arith.cmpf oge, %60, %61 : vector<25x1xf32>
    %cst_27 = arith.constant 1.600000e+01 : f32
    %63 = vector.broadcast %cst_27 : f32 to vector<25x1xf32>
    %64 = arith.cmpf ole, %60, %63 : vector<25x1xf32>
    %65 = arith.andi %62, %64 : vector<25x1xi1>
    %66 = arith.extui %65 : vector<25x1xi1> to vector<25x1xi32>
    %67 = arith.sitofp %66 : vector<25x1xi32> to vector<25x1xf32>
    %cst_28 = arith.constant 0.000000e+00 : f32
    %cst_29 = arith.constant 1.500000e+01 : f32
    %68 = vector.broadcast %cst_28 : f32 to vector<25x1xf32>
    %69 = arith.maximumf %68, %60 : vector<25x1xf32>
    %70 = vector.broadcast %cst_29 : f32 to vector<25x1xf32>
    %71 = arith.minimumf %70, %69 : vector<25x1xf32>
    %72 = vector.broadcast %71 : vector<25x1xf32> to vector<25x256xf32>
    %73 = vector.broadcast %20 : vector<1x256xf32> to vector<25x256xf32>
    %74 = arith.subf %72, %73 : vector<25x256xf32>
    %75 = math.absf %74 : vector<25x256xf32>
    %cst_30 = arith.constant 1.000000e+00 : f32
    %76 = vector.broadcast %cst_30 : f32 to vector<25x256xf32>
    %77 = arith.subf %76, %75 : vector<25x256xf32>
    %cst_31 = arith.constant 0.000000e+00 : f32
    %78 = vector.broadcast %cst_31 : f32 to vector<25x256xf32>
    %79 = arith.maximumf %77, %78 : vector<25x256xf32>
    %80 = vector.broadcast %67 : vector<25x1xf32> to vector<25x256xf32>
    %81 = arith.mulf %80, %79 : vector<25x256xf32>
    %82 = arith.addf %52, %81 : vector<25x256xf32>
    %cst_32 = arith.constant 0.000000e+00 : f32
    %83 = vector.broadcast %cst_32 : f32 to vector<25x256xf32>
    %84 = vector.broadcast %17 : f32 to vector<25x1xf32>
    %85 = arith.mulf %19, %84 : vector<25x1xf32>
    %86 = vector.broadcast %2 : f32 to vector<25x1xf32>
    %87 = arith.addf %86, %85 : vector<25x1xf32>
    %cst_33 = arith.constant 5.000000e-01 : f32
    %88 = arith.mulf %cst_33, %17 : f32
    %cst_34 = arith.constant 2.000000e+00 : f32
    %89 = arith.divf %88, %cst_34 : f32
    %90 = vector.broadcast %89 : f32 to vector<25x1xf32>
    %91 = arith.addf %87, %90 : vector<25x1xf32>
    %cst_35 = arith.constant -1.000000e+00 : f32
    %92 = vector.broadcast %cst_35 : f32 to vector<25x1xf32>
    %93 = arith.cmpf oge, %91, %92 : vector<25x1xf32>
    %cst_36 = arith.constant 1.600000e+01 : f32
    %94 = vector.broadcast %cst_36 : f32 to vector<25x1xf32>
    %95 = arith.cmpf ole, %91, %94 : vector<25x1xf32>
    %96 = arith.andi %93, %95 : vector<25x1xi1>
    %97 = arith.extui %96 : vector<25x1xi1> to vector<25x1xi32>
    %98 = arith.sitofp %97 : vector<25x1xi32> to vector<25x1xf32>
    %cst_37 = arith.constant 0.000000e+00 : f32
    %cst_38 = arith.constant 1.500000e+01 : f32
    %99 = vector.broadcast %cst_37 : f32 to vector<25x1xf32>
    %100 = arith.maximumf %99, %91 : vector<25x1xf32>
    %101 = vector.broadcast %cst_38 : f32 to vector<25x1xf32>
    %102 = arith.minimumf %101, %100 : vector<25x1xf32>
    %103 = vector.broadcast %102 : vector<25x1xf32> to vector<25x256xf32>
    %104 = vector.broadcast %21 : vector<1x256xf32> to vector<25x256xf32>
    %105 = arith.subf %103, %104 : vector<25x256xf32>
    %106 = math.absf %105 : vector<25x256xf32>
    %cst_39 = arith.constant 1.000000e+00 : f32
    %107 = vector.broadcast %cst_39 : f32 to vector<25x256xf32>
    %108 = arith.subf %107, %106 : vector<25x256xf32>
    %cst_40 = arith.constant 0.000000e+00 : f32
    %109 = vector.broadcast %cst_40 : f32 to vector<25x256xf32>
    %110 = arith.maximumf %108, %109 : vector<25x256xf32>
    %111 = vector.broadcast %98 : vector<25x1xf32> to vector<25x256xf32>
    %112 = arith.mulf %111, %110 : vector<25x256xf32>
    %113 = arith.addf %83, %112 : vector<25x256xf32>
    %114 = vector.broadcast %17 : f32 to vector<25x1xf32>
    %115 = arith.mulf %19, %114 : vector<25x1xf32>
    %116 = vector.broadcast %2 : f32 to vector<25x1xf32>
    %117 = arith.addf %116, %115 : vector<25x1xf32>
    %cst_41 = arith.constant 1.500000e+00 : f32
    %118 = arith.mulf %cst_41, %17 : f32
    %cst_42 = arith.constant 2.000000e+00 : f32
    %119 = arith.divf %118, %cst_42 : f32
    %120 = vector.broadcast %119 : f32 to vector<25x1xf32>
    %121 = arith.addf %117, %120 : vector<25x1xf32>
    %cst_43 = arith.constant -1.000000e+00 : f32
    %122 = vector.broadcast %cst_43 : f32 to vector<25x1xf32>
    %123 = arith.cmpf oge, %121, %122 : vector<25x1xf32>
    %cst_44 = arith.constant 1.600000e+01 : f32
    %124 = vector.broadcast %cst_44 : f32 to vector<25x1xf32>
    %125 = arith.cmpf ole, %121, %124 : vector<25x1xf32>
    %126 = arith.andi %123, %125 : vector<25x1xi1>
    %127 = arith.extui %126 : vector<25x1xi1> to vector<25x1xi32>
    %128 = arith.sitofp %127 : vector<25x1xi32> to vector<25x1xf32>
    %cst_45 = arith.constant 0.000000e+00 : f32
    %cst_46 = arith.constant 1.500000e+01 : f32
    %129 = vector.broadcast %cst_45 : f32 to vector<25x1xf32>
    %130 = arith.maximumf %129, %121 : vector<25x1xf32>
    %131 = vector.broadcast %cst_46 : f32 to vector<25x1xf32>
    %132 = arith.minimumf %131, %130 : vector<25x1xf32>
    %133 = vector.broadcast %132 : vector<25x1xf32> to vector<25x256xf32>
    %134 = vector.broadcast %21 : vector<1x256xf32> to vector<25x256xf32>
    %135 = arith.subf %133, %134 : vector<25x256xf32>
    %136 = math.absf %135 : vector<25x256xf32>
    %cst_47 = arith.constant 1.000000e+00 : f32
    %137 = vector.broadcast %cst_47 : f32 to vector<25x256xf32>
    %138 = arith.subf %137, %136 : vector<25x256xf32>
    %cst_48 = arith.constant 0.000000e+00 : f32
    %139 = vector.broadcast %cst_48 : f32 to vector<25x256xf32>
    %140 = arith.maximumf %138, %139 : vector<25x256xf32>
    %141 = vector.broadcast %128 : vector<25x1xf32> to vector<25x256xf32>
    %142 = arith.mulf %141, %140 : vector<25x256xf32>
    %143 = arith.addf %113, %142 : vector<25x256xf32>
    %144 = arith.mulf %82, %143 : vector<25x256xf32>
    %cst_49 = arith.constant 2.500000e-01 : f32
    %145 = vector.broadcast %cst_49 : f32 to vector<25x256xf32>
    %146 = arith.mulf %144, %145 : vector<25x256xf32>
    %c0_50 = arith.constant 0 : index
    %c0_51 = arith.constant 0 : index
    %c0_52 = arith.constant 0 : index
    %147 = vector.load %arg7[%c0_50, %c0_51, %c0_52] : memref<1x256x4xf32, #tpu.memory_space<vmem>>, vector<1x256x4xf32>
    %148 = vector.shape_cast %147 : vector<1x256x4xf32> to vector<256x4xf32>
    %cst_53 = arith.constant dense<0.000000e+00> : vector<25x4xf32>
    %149 = tpu.matmul %146, %148, %cst_53 {dimension_numbers = #tpu.dot_dimension_numbers<[1], [0], [0], [1], [0, 0, 1, 1], [], []>, precision = #tpu.contract_precision<fp32>} : vector<25x256xf32>, vector<256x4xf32>, vector<25x4xf32> -> vector<25x4xf32>
    %c0_54 = arith.constant 0 : index
    %c0_55 = arith.constant 0 : index
    %c0_56 = arith.constant 0 : index
    %150 = vector.load %arg8[%c0_54, %c0_55, %c0_56] : memref<1x25x4xf32, #tpu.memory_space<vmem>>, vector<1x25x4xf32>
    %151 = vector.shape_cast %150 : vector<1x25x4xf32> to vector<25x4xf32>
    %152 = vector.shape_cast %149 : vector<25x4xf32> to vector<1x25x4xf32>
    tpu.vector_store %arg8[%c0_54, %c0_55, %c0_56], %152 {strides = array<i32>} : memref<1x25x4xf32, #tpu.memory_space<vmem>>, vector<1x25x4xf32>,
    return
  }
  func.func @transform_0(%arg0: i32, %arg1: memref<4xi32, #tpu.memory_space<smem>>) -> (i32, i32) {
    %c0_i32 = arith.constant 0 : i32
    %c0_i32_0 = arith.constant 0 : i32
    %c0_i32_1 = arith.constant 0 : i32
    return %c0_i32, %c0_i32_0 : i32, i32
  }
  func.func @transform_1(%arg0: i32, %arg1: memref<4xi32, #tpu.memory_space<smem>>) -> (i32, i32) {
    %c0_i32 = arith.constant 0 : i32
    %c0_i32_0 = arith.constant 0 : i32
    %c0_i32_1 = arith.constant 0 : i32
    return %c0_i32, %c0_i32_0 : i32, i32
  }
  func.func @transform_2(%arg0: i32, %arg1: memref<4xi32, #tpu.memory_space<smem>>) -> (i32, i32) {
    %c0_i32 = arith.constant 0 : i32
    %c0_i32_0 = arith.constant 0 : i32
    %c0_i32_1 = arith.constant 0 : i32
    return %c0_i32, %c0_i32_0 : i32, i32
  }
  func.func @transform_3(%arg0: i32, %arg1: memref<4xi32, #tpu.memory_space<smem>>) -> (i32, i32) {
    %c0_i32 = arith.constant 0 : i32
    %c0_i32_0 = arith.constant 0 : i32
    %c0_i32_1 = arith.constant 0 : i32
    return %c0_i32, %c0_i32_0 : i32, i32
  }
  func.func @transform_4(%arg0: i32, %arg1: memref<4xi32, #tpu.memory_space<smem>>) -> (i32, i32) {
    %c0_i32 = arith.constant 0 : i32
    %c0_i32_0 = arith.constant 0 : i32
    %c0_i32_1 = arith.constant 0 : i32
    return %c0_i32, %c0_i32_0 : i32, i32
  }
  func.func @transform_5(%arg0: i32, %arg1: memref<4xi32, #tpu.memory_space<smem>>) -> (i32, i32, i32) {
    %0 = arith.index_cast %arg0 : i32 to index
    %1 = memref.load %arg1[%0] : memref<4xi32, #tpu.memory_space<smem>>
    %c0_i32 = arith.constant 0 : i32
    %c0_i32_0 = arith.constant 0 : i32
    %c0_i32_1 = arith.constant 0 : i32
    return %1, %c0_i32, %c0_i32_0 : i32, i32, i32
  }
  func.func @transform_6(%arg0: i32, %arg1: memref<4xi32, #tpu.memory_space<smem>>) -> (i32, i32, i32) {
    %c0_i32 = arith.constant 0 : i32
    %c0_i32_0 = arith.constant 0 : i32
    %c0_i32_1 = arith.constant 0 : i32
    return %arg0, %c0_i32, %c0_i32_0 : i32, i32, i32
  }
}

</mosaic_0001>

<bundles_post_ra>
// kernel: roi_align_pallas.1
= control target key start
LH: loop header
LB: loop body
LE: loop exit
PB: predicated region body
PF: predicated region fallthrough
CT: control target
= control target key end

     0   :  { %s2031_s27 = smov [#allocation3]   ;;  %s2970_s0 = inlined_call_operand.vmem [shape: s32[4], index: 0, kind: input, shape index: {}]   ;;  %s2971_s1 = inlined_call_operand.vmem [shape: f32[4,4], index: 1, kind: input, shape index: {}]   ;;  %s2972_s2 = inlined_call_operand.vmem [shape: f32[25,1], index: 2, kind: input, shape index: {}]   ;;  %s2973_s3 = inlined_call_operand.vmem [shape: f32[25,1], index: 3, kind: input, shape index: {}]   ;;  %s2974_s4 = inlined_call_operand.vmem [shape: f32[1,256], index: 4, kind: input, shape index: {}]   ;;  %s2975_s5 = inlined_call_operand.vmem [shape: f32[1,256], index: 5, kind: input, shape index: {}]   ;;  %s2976_s6 = inlined_call_operand.vmem [shape: f32[2,256,4], index: 6, kind: input, shape index: {}]   ;;  %s2977_s7 = inlined_call_operand.vmem [shape: f32[4,25,4], index: 7, kind: output, shape index: {}]  }
   0x1   :  { %s13_s26 = sshll.u32 %s2970_s0, 4  ;;  %s14_s26 = int_to_ptr.vmem [resolvable:$true] %s13_s26 }
   0x2   :  { %16 = dma.vmem_to_smem %s14_s26, 16, %s2031_s27, [#allocation2] }
   0x3   :  { %2021 = dma.done.wait [#allocation2], 16 }
   0x4   :  { %2022 = vsyncadd [#allocation2], 4294967280 }
   0x5   :  { %19 = sfence }
   0x6   :  { %20 = vsyncpa [#allocation5], 0  ;;  %s2081_s28 = smov 0  }
   0x7 LB: > { %s2087_s29 = sadd.s32 4294967295, %s2029_s28   ;;  %p1876_p0 = scmp.ge.s32.totalorder %s2029_s28, 1  ;;  %s2029_s28 = sphi %s2081_s28, %s26_s28  }
   0x8   : > { %p190_p1 = scmp.lt.s32.totalorder %s2029_s28, 5  ;;  %s202_s8 = sshll.u32 %s2971_s1, 4  ;;  %s203_s8 = int_to_ptr.vmem [resolvable:$true] %s202_s8 }
   0x9   : > { %p1926_p3 = scmp.eq.s32.totalorder %s2087_s29, 0  ;;  %s2032_s9 = smov [#allocation4]  }
   0xa   : > { %p191_p2 = pnand %p1876_p0, %p190_p1 }
   0xc   : > { %p1922_p4 = pneg %p191_p2  ;;  %237 = sbr.rel (%p191_p2) target bundleno = 505 (0x1f9), region = 44 }
   0xe   : > { %p1923_p5 = pnand %p1926_p3, %p1922_p4 }
  0x10   : > { %1925 = dma.vmem_to_smem (!%p1923_p5), %s203_s8, 64, %s2032_s9, [#allocation5]  }
  0x11   : > { %2024 = dma.done.wait (%p1926_p3), [#allocation5], 64  }
  0x12   : > { %2026 = vsyncadd (%p1926_p3), [#allocation5], 4294967232 }
  0x13   : > { %244 = sfence }
  0x14   : > { %v2033_v0 = vmov 5.0   ;;  %v2034_v1 = vmov 2.0   ;;  %s283_s10 = sshra.s32 %s2087_s29, 7  ;;  %s288_s13 = sand.u32 127, %s2087_s29  ;;  %v2035_v14 = vmov 0   ;;  %v321_v15 = vld [vmem:[%s2972_s2] sm:$0xff] }
  0x15   : > { %1986 = vrcp.f32 %v2033_v0  ;;  %s1908_s11 = sshll.u32 %s283_s10, 7  ;;  %1965 = vset.pattern.permute.xlu1 %v2035_v14  ;;  %1964 = vset.pattern.permute.xlu0 %v2035_v14  ;;  %s282_s18 = sld [smem:[#allocation4 + %s2087_s29]]  ;;  %v325_v16 = vld [vmem:[%s2973_s3] sm:$0xff]  ;;  %v322_v28 = vld [vmem:[%s2972_s2 + $0x8] sm:$0xff]  ;;  %v2037_v42 = vmov 0.0   ;;  %v323_v47 = vld [vmem:[%s2972_s2 + $0x10] sm:$0xff] }
  0x16   : > { %1988 = vrcp.f32 %v2034_v1  ;;  %s1909_s12 = sadd.s32 128, %s1908_s11  ;;  %s1913_s14 = sadd.s32 384, %s1908_s11  ;;  %1943 = vset.pattern.permute.xlu2 %v2035_v14  ;;  %v326_v31 = vld [vmem:[%s2973_s3 + $0x8] sm:$0xff]  ;;  %v327_v60 = vld [vmem:[%s2973_s3 + $0x10] sm:$0xff] }
  0x17   : > { %s1911_s15 = sadd.s32 256, %s1908_s11  ;;  %s289_s16 = sadd.s32 %s1909_s12, %s288_s13 }
  0x18   : > { %s297_s17 = sadd.s32 %s1913_s14, %s288_s13  ;;  %s293_s19 = sadd.s32 %s1911_s15, %s288_s13 }
  0x19   : > { %s290_s20 = sld [smem:[#allocation4 + %s289_s16]]  ;;  %s2036_s25 = smov 1.0  }
  0x1a   : > { %s298_s21 = sld [smem:[#allocation4 + %s297_s17]]  ;;  %p277_p7 = scmp.lt.s32.totalorder %s2087_s29, 3 }
  0x1b   : > { %v1987_v2 = vpop.eup %1986  ;;  %s294_s22 = sld [smem:[#allocation4 + %s293_s19]]  ;;  %v2111_v21 = vstv %s282_s18 }
  0x1c   : > { %v1989_v3 = vpop.eup %1988  ;;  %v304_v4 = vmul.f32 5.0, %v1987_v2  ;;  %vm308_vm0 = vweird.f32 %v1987_v2  ;;  %s270_s12 = sld [smem:[#allocation3 + %s2087_s29]]  ;;  %s3051_s29 = smov (!%p277_p7, %s2087_s29), 3 }
  0x1d   : > { %v343_v5 = vmul.f32 2.0, %v1989_v3  ;;  %vm347_vm1 = vweird.f32 %v1989_v3 }
  0x1e   : > { %v305_v6 = vsub.f32 1.0, %v304_v4 }
  0x1f   : > { %v344_v7 = vsub.f32 1.0, %v343_v5  ;;  %v2107_v19 = vstv %s290_s20 }
  0x20   : > { %v306_v8 = vmul.f32 %v1987_v2, %v305_v6  ;;  %s301_s23 = ssub.f32 %s298_s21, %s290_s20 }
  0x21   : > { %v345_v9 = vmul.f32 %v1989_v3, %v344_v7  ;;  %s299_s24 = ssub.f32 %s294_s22, %s282_s18  ;;  %s1907_s22 = sshll.u32 %s3051_s29, 5 }
  0x22   : > { %v307_v10 = vadd.f32 %v1987_v2, %v306_v8  ;;  %s302_s26 = smax.f32 %s2036_s25, %s301_s23  ;;  %v324_v8 = vld [vmem:[%s2972_s2 + $0x18] sm:$0x1]  ;;  %p271_p6 = scmp.lt.s32.totalorder %s270_s12, 1 }
  0x23   : > { %v346_v11 = vadd.f32 %v1989_v3, %v345_v9  ;;  %s300_s27 = smax.f32 %s2036_s25, %s299_s24  ;;  %s2958_s24 = scalar_lea.vmem %s2977_s7, %s1907_s22 }
  0x24   : > { %v309_v12 = vsel %vm308_vm0, %v1987_v2, %v307_v10  ;;  %s3049_s12 = smov (!%p271_p6, %s270_s12), 1 }
  0x25   : > { %1914 = vpush %v309_v12  ;;  %v348_v13 = vsel %vm347_vm1, %v1989_v3, %v346_v11  ;;  %s1906_s14 = sshll.u32 %s3049_s12, 8 }
  0x26   : > { %1916 = vpush %v348_v13 }
  0x56   : > { %s1915_s0 = spop %1914 }
  0x57   : > { %s311_s30 = smul.f32 %s1915_s0, %s302_s26  ;;  %s1917_s11 = spop %1916 }
  0x58   : > { %s320_s10 = smul.f32 %s1915_s0, %s300_s27 }
  0x59   : > { %v2104_v17 = vstv %s311_s30  ;;  %s341_s13 = smul.f32 0.5, %s311_s30 }
  0x5a   : > { %v332_v18 = vmul.f32 %v2104_v17, %v321_v15  ;;  %s477_s15 = smul.f32 1.5, %s311_s30  ;;  %v2109_v20 = vstv %s320_s10  ;;  %v333_v34 = vmul.f32 %v2104_v17, %v322_v28  ;;  %v334_v52 = vmul.f32 %v2104_v17, %v323_v47 }
  0x5b   : > { %s350_s16 = smul.f32 %s1917_s11, %s341_s13  ;;  %v609_v22 = vmul.f32 %v2109_v20, %v325_v16  ;;  %v610_v38 = vmul.f32 %v2109_v20, %v326_v31  ;;  %v611_v0 = vmul.f32 %v2109_v20, %v327_v60  ;;  %v335_v11 = vmul.f32 %v2104_v17, %v324_v8 }
  0x5c   : > { %s486_s17 = smul.f32 %s1917_s11, %s477_s15  ;;  %v337_v23 = vadd.f32 %v2107_v19, %v332_v18  ;;  %v338_v41 = vadd.f32 %v2107_v19, %v333_v34  ;;  %v339_v58 = vadd.f32 %v2107_v19, %v334_v52 }
  0x5d   : > { %s618_s19 = smul.f32 0.5, %s320_s10  ;;  %v2115_v24 = vstv %s350_s16  ;;  %v614_v26 = vadd.f32 %v2111_v21, %v609_v22  ;;  %v615_v45 = vadd.f32 %v2111_v21, %v610_v38  ;;  %v616_v6 = vadd.f32 %v2111_v21, %v611_v0  ;;  %s2195_s16 = scalar_lea.vmem %s2976_s6, %s1906_s14 }
  0x5e   : > { %v2117_v25 = vstv %s486_s17  ;;  %s754_s20 = smul.f32 1.5, %s320_s10  ;;  %v352_v30 = vadd.f32 %v2115_v24, %v337_v23  ;;  %v2144_v50 = vadd.f32 %v2115_v24, %v338_v41  ;;  %v354_v1 = vadd.f32 %v2115_v24, %v339_v58 }
  0x5f   : > { %v488_v27 = vadd.f32 %v2117_v25, %v337_v23  ;;  %s627_s21 = smul.f32 %s1917_s11, %s618_s19  ;;  %v489_v51 = vadd.f32 %v2117_v25, %v338_v41  ;;  %v490_v12 = vadd.f32 %v2117_v25, %v339_v58  ;;  %v328_v23 = vld [vmem:[%s2973_s3 + $0x18] sm:$0x1]  ;;  %v915_v58 = vld [vmem:[%s2195_s16 + $0x70] sm:$0xff] }
  0x60   : > { %s763_s18 = smul.f32 %s1917_s11, %s754_s20  ;;  %v376_v36 = vmax.f32 %v352_v30, 0.0  ;;  %vm356_vm3 = vcmp.ge.f32.partialorder %v352_v30, -1.0  ;;  %vm360_vm4 = vcmp.le.f32.partialorder %v352_v30, 16.0  ;;  %vm357_vm14 = vcmp.ge.f32.partialorder %v2144_v50, -1.0 }
  0x61   : > { %v2124_v29 = vstv %s627_s21  ;;  %vm492_vm2 = vcmp.ge.f32.partialorder %v488_v27, -1.0  ;;  %vm496_vm5 = vcmp.le.f32.partialorder %v488_v27, 16.0  ;;  %vm364_vm6 = vmand %vm356_vm3, %vm360_vm4  ;;  %v512_v48 = vmax.f32 %v488_v27, 0.0 }
  0x62   : > { %v2130_v32 = vstv %s763_s18  ;;  %v629_v33 = vadd.f32 %v2124_v29, %v614_v26  ;;  %v380_v39 = vmin.f32 %v376_v36, 15.0  ;;  %v1888_v43 = vsel %vm364_vm6, 1.0, %v2037_v42  ;;  %vm500_vm7 = vmand %vm492_vm2, %vm496_vm5 }
  0x63   : > { %v765_v35 = vadd.f32 %v2130_v32, %v614_v26  ;;  %v1892_v44 = vsel %vm500_vm7, 1.0, %v2037_v42  ;;  %v630_v53 = vadd.f32 %v2124_v29, %v615_v45  ;;  %v516_v54 = vmin.f32 %v512_v48, 15.0 }
  0x64   : > { %v653_v37 = vmax.f32 %v629_v33, 0.0  ;;  %vm633_vm8 = vcmp.ge.f32.partialorder %v629_v33, -1.0  ;;  %vm637_vm9 = vcmp.le.f32.partialorder %v629_v33, 16.0  ;;  %386 = vperm.xlu0 %1964, %v380_v39   ;;  %v1944_v46 = vpack.i.bf16 %v1892_v44, %v1888_v43 }
  0x65   : > { %vm769_vm10 = vcmp.ge.f32.partialorder %v765_v35, -1.0  ;;  %vm773_vm11 = vcmp.le.f32.partialorder %v765_v35, 16.0  ;;  %v789_v49 = vmax.f32 %v765_v35, 0.0  ;;  %vm641_vm12 = vmand %vm633_vm8, %vm637_vm9  ;;  %vm361_vm15 = vcmp.le.f32.partialorder %v2144_v50, 16.0 }
  0x66   : > { %v657_v40 = vmin.f32 %v653_v37, 15.0  ;;  %1945 = vperm.xlu2 %1943, %v1944_v46   ;;  %vm777_vm13 = vmand %vm769_vm10, %vm773_vm11  ;;  %v1896_v56 = vsel %vm641_vm12, 1.0, %v2037_v42  ;;  %vm493_vm0 = vcmp.ge.f32.partialorder %v489_v51, -1.0  ;;  %vm497_vm1 = vcmp.le.f32.partialorder %v489_v51, 16.0 }
  0x67   : > { %v793_v55 = vmin.f32 %v789_v49, 15.0  ;;  %v1900_v57 = vsel %vm777_vm13, 1.0, %v2037_v42  ;;  %v513_v61 = vmax.f32 %v489_v51, 0.0  ;;  %v654_v62 = vmax.f32 %v630_v53, 0.0  ;;  %vm365_vm2 = vmand %vm357_vm14, %vm361_vm15 }
  0x68   : > { %663 = vperm.xlu1 %1965, %v657_v40   ;;  %v1949_v59 = vpack.i.bf16 %v1900_v57, %v1896_v56  ;;  %vm501_vm3 = vmand %vm493_vm0, %vm497_vm1  ;;  %v766_v63 = vadd.f32 %v2130_v32, %v615_v45  ;;  %v1889_v4 = vsel %vm365_vm2, 1.0, %v2037_v42  ;;  %vm634_vm4 = vcmp.ge.f32.partialorder %v630_v53, -1.0  ;;  %v916_v57 = vld [vmem:[%s2195_s16 + $0x78] sm:$0xff] }
  0x69   : > { %v517_v2 = vmin.f32 %v513_v61, 15.0  ;;  %v658_v3 = vmin.f32 %v654_v62, 15.0  ;;  %v1893_v5 = vsel %vm501_vm3, 1.0, %v2037_v42  ;;  %vm638_vm5 = vcmp.le.f32.partialorder %v630_v53, 16.0 }
  0x6a   : > { %vm770_vm6 = vcmp.ge.f32.partialorder %v766_v63, -1.0  ;;  %vm774_vm7 = vcmp.le.f32.partialorder %v766_v63, 16.0  ;;  %v1954_v7 = vpack.i.bf16 %v1893_v5, %v1889_v4  ;;  %v790_v9 = vmax.f32 %v766_v63, 0.0  ;;  %vm642_vm8 = vmand %vm634_vm4, %vm638_vm5  ;;  %v914_v4 = vld [vmem:[%s2195_s16 + $0x68] sm:$0xff]  ;;  %v913_v5 = vld [vmem:[%s2195_s16 + $0x60] sm:$0xff] }
  0x6b   : > { %v378_v10 = vmax.f32 %v354_v1, 0.0  ;;  %vm778_vm9 = vmand %vm770_vm6, %vm774_vm7  ;;  %v631_v13 = vadd.f32 %v2124_v29, %v616_v6  ;;  %v1897_v16 = vsel %vm642_vm8, 1.0, %v2037_v42  ;;  %v340_v26 = vadd.f32 %v2107_v19, %v335_v11  ;;  %v911_v11 = vld [vmem:[%s2195_s16 + $0x50] sm:$0xff] }
  0x6c   : > { %522 = vperm.xlu0 %1964, %v516_v54   ;;  %v794_v14 = vmin.f32 %v790_v9, 15.0  ;;  %v1901_v18 = vsel %vm778_vm9, 1.0, %v2037_v42  ;;  %v514_v17 = vmax.f32 %v490_v12, 0.0  ;;  %v612_v28 = vmul.f32 %v2109_v20, %v328_v23 }
  0x6d   : > { %v382_v15 = vmin.f32 %v378_v10, 15.0  ;;  %v1959_v22 = vpack.i.bf16 %v1901_v18, %v1897_v16  ;;  %v655_v27 = vmax.f32 %v631_v13, 0.0  ;;  %v377_v30 = vmax.f32 %v2144_v50, 0.0 }
  0x6e   : > { %1950 = vperm.xlu2 %1943, %v1949_v59   ;;  %v355_v31 = vadd.f32 %v2115_v24, %v340_v26  ;;  %v767_v33 = vadd.f32 %v2130_v32, %v616_v6  ;;  %v518_v34 = vmin.f32 %v514_v17, 15.0  ;;  %vm358_vm10 = vcmp.ge.f32.partialorder %v354_v1, -1.0  ;;  %v912_v6 = vld [vmem:[%s2195_s16 + $0x58] sm:$0xff] }
  0x6f   : > { %v659_v35 = vmin.f32 %v655_v27, 15.0  ;;  %vm362_vm11 = vcmp.le.f32.partialorder %v354_v1, 16.0  ;;  %vm494_vm12 = vcmp.ge.f32.partialorder %v490_v12, -1.0  ;;  %vm498_vm13 = vcmp.le.f32.partialorder %v490_v12, 16.0 }
  0x70   : > { %799 = vperm.xlu1 %1965, %v793_v55   ;;  %v617_v19 = vadd.f32 %v2111_v21, %v612_v28  ;;  %v381_v36 = vmin.f32 %v377_v30, 15.0  ;;  %v791_v37 = vmax.f32 %v767_v33, 0.0  ;;  %v379_v38 = vmax.f32 %v355_v31, 0.0  ;;  %vm366_vm14 = vmand %vm358_vm10, %vm362_vm11  ;;  %v910_v30 = vld [vmem:[%s2195_s16 + $0x48] sm:$0xff] }
  0x71   : > { %vm502_vm15 = vmand %vm494_vm12, %vm498_vm13  ;;  %v491_v20 = vadd.f32 %v2117_v25, %v340_v26  ;;  %v1890_v41 = vsel %vm366_vm14, 1.0, %v2037_v42  ;;  %vm635_vm0 = vcmp.ge.f32.partialorder %v631_v13, -1.0  ;;  %vm639_vm1 = vcmp.le.f32.partialorder %v631_v13, 16.0 }
  0x72   : > { %v632_v24 = vadd.f32 %v2124_v29, %v617_v19  ;;  %v795_v39 = vmin.f32 %v791_v37, 15.0  ;;  %v383_v40 = vmin.f32 %v379_v38, 15.0  ;;  %v1894_v43 = vsel %vm502_vm15, 1.0, %v2037_v42  ;;  %vm643_vm4 = vmand %vm635_vm0, %vm639_vm1 }
  0x73   : > { %vm771_vm2 = vcmp.ge.f32.partialorder %v767_v33, -1.0  ;;  %vm775_vm3 = vcmp.le.f32.partialorder %v767_v33, 16.0  ;;  %v1966_v21 = vpack.i.bf16 %v1894_v43, %v1890_v41  ;;  %v515_v44 = vmax.f32 %v491_v20, 0.0 }
  0x74   : > { %527 = vperm.xlu0 %1964, %v517_v2   ;;  %v656_v45 = vmax.f32 %v632_v24, 0.0  ;;  %vm779_vm5 = vmand %vm771_vm2, %vm775_vm3  ;;  %v768_v25 = vadd.f32 %v2130_v32, %v617_v19  ;;  %vm359_vm6 = vcmp.ge.f32.partialorder %v355_v31, -1.0  ;;  %vm363_vm7 = vcmp.le.f32.partialorder %v355_v31, 16.0 }
  0x75   : > { %vm495_vm8 = vcmp.ge.f32.partialorder %v491_v20, -1.0  ;;  %vm499_vm9 = vcmp.le.f32.partialorder %v491_v20, 16.0  ;;  %v519_v29 = vmin.f32 %v515_v44, 15.0  ;;  %v1898_v47 = vsel %vm643_vm4, 1.0, %v2037_v42  ;;  %vm367_vm10 = vmand %vm359_vm6, %vm363_vm7  ;;  %v907_v44 = vld [vmem:[%s2195_s16 + $0x30] sm:$0xff] }
  0x76   : > { %1955 = vperm.xlu2 %1943, %v1954_v7   ;;  %v660_v46 = vmin.f32 %v656_v45, 15.0  ;;  %v1902_v48 = vsel %vm779_vm5, 1.0, %v2037_v42  ;;  %vm636_vm11 = vcmp.ge.f32.partialorder %v632_v24, -1.0  ;;  %vm640_vm12 = vcmp.le.f32.partialorder %v632_v24, 16.0  ;;  %vm503_vm13 = vmand %vm495_vm8, %vm499_vm9  ;;  %v908_v24 = vld [vmem:[%s2195_s16 + $0x38] sm:$0xff] }
  0x77   : > { %vm772_vm14 = vcmp.ge.f32.partialorder %v768_v25, -1.0  ;;  %vm776_vm15 = vcmp.le.f32.partialorder %v768_v25, 16.0  ;;  %v1971_v32 = vpack.i.bf16 %v1902_v48, %v1898_v47  ;;  %v792_v49 = vmax.f32 %v768_v25, 0.0  ;;  %vm644_vm0 = vmand %vm636_vm11, %vm640_vm12  ;;  %v330_v45 = vld [vmem:[%s2975_s5] sm:$0x3] }
  0x78   : > { %668 = vperm.xlu1 %1965, %v658_v3   ;;  %v1891_v50 = vsel %vm367_vm10, 1.0, %v2037_v42  ;;  %v1895_v51 = vsel %vm503_vm13, 1.0, %v2037_v42  ;;  %vm780_vm1 = vmand %vm772_vm14, %vm776_vm15  ;;  %v1899_v54 = vsel %vm644_vm0, 1.0, %v2037_v42  ;;  %v2199_v59 = vand.u32 4294901760, %v916_v57 }
  0x79   : > { %v796_v52 = vmin.f32 %v792_v49, 15.0  ;;  %v1976_v53 = vpack.i.bf16 %v1895_v51, %v1891_v50  ;;  %v1903_v55 = vsel %vm780_vm1, 1.0, %v2037_v42  ;;  %v2201_v42 = vand.u32 4294901760, %v915_v58 }
  0x7a   : > { %v1981_v56 = vpack.i.bf16 %v1903_v55, %v1899_v54  ;;  %v2204_v60 = vsub.f32 %v916_v57, %v2199_v59  ;;  %1181 = vmatpush.msra.mxu3 %v2199_v59  ;;  %934 = vmatpush.msra.mxu0 %v2199_v59  ;;  %v2228_v8 = vand.u32 4294901760, %v914_v4  ;;  %v2230_v9 = vand.u32 4294901760, %v913_v5 }
  0x7b   : > { %v2207_v61 = vsub.f32 %v915_v58, %v2201_v42  ;;  %v2232_v10 = vand.u32 4294901760, %v912_v6  ;;  %v2235_v12 = vand.u32 4294901760, %v911_v11  ;;  %v2277_v19 = vand.u32 4294901760, %v910_v30  ;;  %v905_v58 = vld [vmem:[%s2195_s16 + $0x20] sm:$0xff] }
  0x7c   : > { %804 = vperm.xlu0 %1964, %v794_v14   ;;  %v2991_v62 = vand.u32 4294901760, %v2204_v60  ;;  %1113 = vmatpush.msra.mxu2 %v2204_v60  ;;  %v2238_v13 = vsub.f32 %v914_v4, %v2228_v8  ;;  %v2241_v14 = vsub.f32 %v913_v5, %v2230_v9  ;;  %v2315_v47 = vand.u32 4294901760, %v907_v44  ;;  %v904_v5 = vld [vmem:[%s2195_s16 + $0x18] sm:$0xff] }
  0x7d   : > { %v2990_v63 = vand.u32 4294901760, %v2207_v61  ;;  %1183 = vmatpush.msra.mxu3 %v2201_v42  ;;  %936 = vmatpush.msra.mxu0 %v2201_v42  ;;  %v2249_v16 = vsub.f32 %v911_v11, %v2235_v12  ;;  %v2283_v38 = vsub.f32 %v910_v30, %v2277_v19  ;;  %v2334_v55 = vperm.slane %v330_v45, 0 }
  0x7e   : > { %1960 = vperm.xlu2 %1943, %v1959_v22   ;;  %v1001_v0 = vsub.f32 %v2204_v60, %v2991_v62  ;;  %1116 = vmatpush.msra.mxu2 %v2207_v61  ;;  %v2989_v18 = vand.u32 4294901760, %v2238_v13  ;;  %v2988_v22 = vand.u32 4294901760, %v2241_v14  ;;  %vm1801_vm2 = vcmask 31744  }
  0x7f   : > { %v1007_v1 = vsub.f32 %v2207_v61, %v2990_v63  ;;  %1185 = vmatpush.msra.mxu3 %v2228_v8  ;;  %938 = vmatpush.msra.mxu0 %v2228_v8  ;;  %v2984_v26 = vand.u32 4294901760, %v2249_v16  ;;  %v2983_v41 = vand.u32 4294901760, %v2283_v38  ;;  %vm1805_vm3 = vcmask 24576  }
  0x80   : > { %396 = vperm.xlu1 %1965, %v382_v15   ;;  %v1002_v2 = vand.u32 4294901760, %v1001_v0  ;;  %v2244_v15 = vsub.f32 %v912_v6, %v2232_v10  ;;  %1119 = vmatpush.msra.mxu2 %v2238_v13  ;;  %v1013_v17 = vsub.f32 %v2238_v13, %v2989_v18  ;;  %v1019_v27 = vsub.f32 %v2241_v14, %v2988_v22  ;;  %v903_v6 = vld [vmem:[%s2195_s16 + $0x10] sm:$0xff]  ;;  %v901_v22 = vld [vmem:[%s2195_s16] sm:$0xff] }
  0x81   : > { %v1008_v3 = vand.u32 4294901760, %v1007_v1  ;;  %1187 = vmatpush.msra.mxu3 %v2230_v9  ;;  %940 = vmatpush.msra.mxu0 %v2230_v9  ;;  %v1037_v25 = vsub.f32 %v2283_v38, %v2983_v41 }
  0x82   : > { %1003 = vmatpush.msra.mxu1 %v1002_v2  ;;  %v2985_v23 = vand.u32 4294901760, %v2244_v15  ;;  %1122 = vmatpush.msra.mxu2 %v2241_v14  ;;  %v1014_v33 = vand.u32 4294901760, %v1013_v17 }
  0x83   : > { %1189 = vmatpush.msra.mxu3 %v2232_v10  ;;  %942 = vmatpush.msra.mxu0 %v2232_v10  ;;  %v1038_v50 = vand.u32 4294901760, %v1037_v25 }
  0x84   : > { %532 = vperm.xlu0 %1964, %v518_v34   ;;  %1009 = vmatpush.msra.mxu1 %v1008_v3  ;;  %v1025_v28 = vsub.f32 %v2244_v15, %v2985_v23  ;;  %v1020_v34 = vand.u32 4294901760, %v1019_v27  ;;  %v2348_v3 = vand.u32 4294901760, %v905_v58 }
  0x85   : > { %1125 = vmatpush.msra.mxu2 %v2244_v15  ;;  %1191 = vmatpush.msra.mxu3 %v2235_v12 }
  0x86   : > { %391 = vperm.xlu2 %1943, %v381_v36   ;;  %v909_v36 = vld [vmem:[%s2195_s16 + $0x40] sm:$0xff]  ;;  %944 = vmatpush.msra.mxu0 %v2235_v12  ;;  %v1026_v37 = vand.u32 4294901760, %v1025_v28  ;;  %v2361_v27 = vsub.f32 %v905_v58, %v2348_v3  ;;  %v2363_v28 = vand.u32 4294901760, %v904_v5 }
  0x87   : > { %1015 = vmatpush.msra.mxu1 %v1014_v33  ;;  %1128 = vmatpush.msra.mxu2 %v2249_v16  ;;  %v2286_v20 = vand.u32 4294901760, %v909_v36 }
  0x88   : > { %673 = vperm.xlu1 %1965, %v659_v35   ;;  %v1031_v35 = vsub.f32 %v2249_v16, %v2984_v26  ;;  %1193 = vmatpush.msra.mxu3 %v2277_v19  ;;  %3008 = vst [vmem:[#allocation8_spill] sm:$0xff] %v2363_v28 }
  0x89   : > { %946 = vmatpush.msra.mxu0 %v2277_v19  ;;  %1021 = vmatpush.msra.mxu1 %v1020_v34  ;;  %v2296_v43 = vsub.f32 %v909_v36, %v2286_v20 }
  0x8a   : > { %1131 = vmatpush.msra.mxu2 %v2283_v38  ;;  %1195 = vmatpush.msra.mxu3 %v2286_v20 }
  0x8b   : > { %948 = vmatpush.msra.mxu0 %v2286_v20  ;;  %1027 = vmatpush.msra.mxu1 %v1026_v37  ;;  %v2369_v37 = vand.u32 4294901760, %v903_v6 }
  0x8c   : > { %809 = vperm.xlu0 %1964, %v795_v39   ;;  %v329_v39 = vld [vmem:[%s2974_s4] sm:$0x3]  ;;  %1134 = vmatpush.msra.mxu2 %v2296_v43 }
  0x8d   : > { %v2317_v48 = vperm.slane %v329_v39, 0  ;;  %v2332_v54 = vperm.slane %v329_v39, 1  ;;  %3009 = vst [vmem:[#allocation9_spill] sm:$0xff] %v2369_v37 }
  0x8e   : > { %1967 = vperm.xlu2 %1943, %v1966_v21   ;;  %v2299_v21 = vand.u32 4294901760, %v908_v24 }
  0x90   : > { %401 = vperm.xlu1 %1965, %v383_v40   ;;  %v1032_v40 = vand.u32 4294901760, %v1031_v35  ;;  %1197 = vmatpush.msra.mxu3 %v2299_v21 }
  0x91   : > { %950 = vmatpush.msra.mxu0 %v2299_v21 }
  0x92   : > { %1033 = vmatpush.msra.mxu1 %v1032_v40  ;;  %1199 = vmatpush.msra.mxu3 %v2315_v47 }
  0x93   : > { %952 = vmatpush.msra.mxu0 %v2315_v47 }
  0x94   : > { %537 = vperm.xlu0 %1964, %v519_v29   ;;  %v2982_v29 = vand.u32 4294901760, %v2296_v43  ;;  %1039 = vmatpush.msra.mxu1 %v1038_v50  ;;  %v2381_v50 = vsub.f32 %v904_v5, %v2363_v28 }
  0x96   : > { %1972 = vperm.xlu2 %1943, %v1971_v32   ;;  %v906_v32 = vld [vmem:[%s2195_s16 + $0x28] sm:$0xff]  ;;  %v1043_v51 = vsub.f32 %v2296_v43, %v2982_v29 }
  0x97   : > { %v2338_v57 = vand.u32 4294901760, %v906_v32 }
  0x98   : > { %678 = vperm.xlu1 %1965, %v660_v46   ;;  %v2312_v46 = vsub.f32 %v908_v24, %v2299_v21  ;;  %v1044_v0 = vand.u32 4294901760, %v1043_v51  ;;  %v902_v51 = vld [vmem:[%s2195_s16 + $0x8] sm:$0xff] }
  0x99   : > { %v2351_v4 = vsub.f32 %v906_v32, %v2338_v57  ;;  %1201 = vmatpush.msra.mxu3 %v2338_v57  ;;  %954 = vmatpush.msra.mxu0 %v2338_v57  ;;  %v2981_v32 = vand.u32 4294901760, %v2361_v27 }
  0x9a   : > { %1137 = vmatpush.msra.mxu2 %v2312_v46  ;;  %1045 = vmatpush.msra.mxu1 %v1044_v0 }
  0x9b   : > { %v2978_v36 = vand.u32 4294901760, %v2351_v4  ;;  %1203 = vmatpush.msra.mxu3 %v2348_v3  ;;  %956 = vmatpush.msra.mxu0 %v2348_v3 }
  0x9c   : > { %814 = vperm.xlu0 %1964, %v796_v52   ;;  %v2980_v52 = vand.u32 4294901760, %v2312_v46 }
  0x9d   : > { %v1061_v25 = vsub.f32 %v2351_v4, %v2978_v36  ;;  %1205 = vmatpush.msra.mxu3 %v2363_v28  ;;  %958 = vmatpush.msra.mxu0 %v2363_v28 }
  0x9e   : > { %1982 = vperm.xlu2 %1943, %v1981_v56   ;;  %v2336_v56 = vperm.slane %v330_v45, 1  ;;  %v1049_v1 = vsub.f32 %v2312_v46, %v2980_v52  ;;  %v2986_v52 = vand.u32 4294901760, %v2381_v50 }
  0x9f   : > { %v1062_v36 = vand.u32 4294901760, %v1061_v25  ;;  %1207 = vmatpush.msra.mxu3 %v2369_v37  ;;  %960 = vmatpush.msra.mxu0 %v2369_v37 }
  0xa0   : > { %1977 = vperm.xlu1 %1965, %v1976_v53   ;;  %v2329_v53 = vsub.f32 %v907_v44, %v2315_v47  ;;  %v1050_v11 = vand.u32 4294901760, %v1049_v1 }
  0xa2   : > { %v2979_v2 = vand.u32 4294901760, %v2329_v53  ;;  %1140 = vmatpush.msra.mxu2 %v2329_v53  ;;  %1051 = vmatpush.msra.mxu1 %v1050_v11  ;;  %v2389_v11 = vsub.f32 %v903_v6, %v2369_v37 }
  0xa4   : > { %v1055_v17 = vsub.f32 %v2329_v53, %v2979_v2  ;;  %1143 = vmatpush.msra.mxu2 %v2351_v4 }
  0xa6   : > { %v1056_v45 = vand.u32 4294901760, %v1055_v17  ;;  %1146 = vmatpush.msra.mxu2 %v2361_v27 }
  0xa8   : > { %1057 = vmatpush.msra.mxu1 %v1056_v45  ;;  %1149 = vmatpush.msra.mxu2 %v2381_v50  ;;  %v2402_v45 = vand.u32 4294901760, %v902_v51 }
  0xaa   : > { %1063 = vmatpush.msra.mxu1 %v1062_v36  ;;  %3010 = vst [vmem:[#allocation10_spill] sm:$0xff] %v2402_v45  ;;  %1152 = vmatpush.msra.mxu2 %v2389_v11  ;;  %v1073_v36 = vsub.f32 %v2381_v50, %v2986_v52 }
  0xab   : > { %1209 = vmatpush.msra.mxu3 %v2402_v45  ;;  %962 = vmatpush.msra.mxu0 %v2402_v45 }
  0xc0   : > { %v2226_v7 = vpop.permute.xlu2 %1945 }
  0xc1   : > { %v1947_v33 = vunpack.i.l.bf16 %v2226_v7 }
  0xc8   : > { %v2271_v31 = vpop.permute.xlu2 %1950 }
  0xc9   : > { %v2992_v5 = vunpack.i.l.bf16 %v2271_v31 }
  0xd0   : > { %v2322_v49 = vpop.permute.xlu2 %1955 }
  0xd6   : > { %v387_v34 = vpop.permute.xlu0 %386 }
  0xd7   : > { %v409_v24 = vsub.f32 %v387_v34, %v2317_v48  ;;  %v410_v39 = vsub.f32 %v387_v34, %v2332_v54 }
  0xd8   : > { %v2386_v34 = vpop.permute.xlu2 %1960 }
  0xd9   : > { %v417_v58 = vand.u32 2147483647, %v409_v24  ;;  %v418_v0 = vand.u32 2147483647, %v410_v39 }
  0xda   : > { %v664_v35 = vpop.permute.xlu1 %663 }
  0xdb   : > { %v686_v40 = vsub.f32 %v664_v35, %v2334_v55  ;;  %v687_v44 = vsub.f32 %v664_v35, %v2336_v56  ;;  %v425_v2 = vsub.f32 1.0, %v417_v58  ;;  %v426_v24 = vsub.f32 1.0, %v418_v0 }
  0xdd   : > { %v694_v1 = vand.u32 2147483647, %v686_v40  ;;  %v695_v35 = vand.u32 2147483647, %v687_v44  ;;  %v1067_v40 = vsub.f32 %v2361_v27, %v2981_v32  ;;  %v2987_v44 = vand.u32 4294901760, %v2389_v11 }
  0xde   : > { %v433_v25 = vmax.f32 %v425_v2, 0.0  ;;  %v434_v58 = vmax.f32 %v426_v24, 0.0  ;;  %v523_v29 = vpop.permute.xlu0 %522  ;;  %v2414_v2 = vsub.f32 %v902_v51, %v2402_v45 }
  0xdf   : > { %v702_v39 = vsub.f32 1.0, %v694_v1  ;;  %v703_v6 = vsub.f32 1.0, %v695_v35  ;;  %v1068_v1 = vand.u32 4294901760, %v1067_v40  ;;  %v1079_v41 = vsub.f32 %v2389_v11, %v2987_v44 }
  0xe0   : > { %v461_v24 = vmul.f32 %v1947_v33, %v433_v25  ;;  %v540_v26 = vsub.f32 %v523_v29, %v2317_v48  ;;  %v541_v52 = vsub.f32 %v523_v29, %v2332_v54  ;;  %1155 = vmatpush.msra.mxu2 %v2414_v2  ;;  %v392_v18 = vpop.permute.xlu2 %391  ;;  %v1074_v25 = vand.u32 4294901760, %v1073_v36 }
  0xe1   : > { %v710_v0 = vmax.f32 %v702_v39, 0.0  ;;  %v462_v39 = vmul.f32 %v1947_v33, %v434_v58  ;;  %v711_v40 = vmax.f32 %v703_v6, 0.0  ;;  %1069 = vmatpush.msra.mxu1 %v1068_v1  ;;  %v1080_v33 = vand.u32 4294901760, %v1079_v41 }
  0xe2   : > { %v800_v35 = vpop.permute.xlu1 %799  ;;  %v548_v51 = vand.u32 2147483647, %v540_v26  ;;  %v2994_v6 = vand.u32 4294901760, %v2414_v2  ;;  %v549_v58 = vand.u32 2147483647, %v541_v52  ;;  %v411_v29 = vsub.f32 %v392_v18, %v2317_v48 }
  0xe3   : > { %v738_v23 = vmul.f32 %v2992_v5, %v710_v0  ;;  %v817_v32 = vsub.f32 %v800_v35, %v2334_v55  ;;  %v818_v44 = vsub.f32 %v800_v35, %v2336_v56  ;;  %v412_v62 = vsub.f32 %v392_v18, %v2332_v54  ;;  %1075 = vmatpush.msra.mxu1 %v1074_v25 }
  0xe4   : > { %v556_v63 = vsub.f32 1.0, %v548_v51  ;;  %v1085_v26 = vsub.f32 %v2414_v2, %v2994_v6  ;;  %v2432_v35 = vand.u32 4294901760, %v901_v22  ;;  %v557_v41 = vsub.f32 1.0, %v549_v58 }
  0xe5   : > { %v825_v1 = vand.u32 2147483647, %v817_v32  ;;  %v826_v0 = vand.u32 2147483647, %v818_v44  ;;  %v419_v5 = vand.u32 2147483647, %v411_v29  ;;  %1081 = vmatpush.msra.mxu1 %v1080_v33  ;;  %v3012_v58 = vunpack.i.h.bf16 %v2226_v7 }
  0xe6   : > { %3011 = vst [vmem:[#allocation11_spill] sm:$0xff] %v2432_v35  ;;  %v564_v30 = vmax.f32 %v556_v63, 0.0  ;;  %v420_v52 = vand.u32 2147483647, %v412_v62  ;;  %v1086_v32 = vand.u32 4294901760, %v1085_v26  ;;  %v2435_v44 = vsub.f32 %v901_v22, %v2432_v35  ;;  %1211 = vmatpush.msra.mxu3 %v2432_v35  ;;  %v528_v6 = vpop.permute.xlu0 %527  ;;  %964 = vmatpush.msra.mxu0 %v2432_v35 }
  0xe7   : > { %v833_v36 = vsub.f32 1.0, %v825_v1  ;;  %v834_v17 = vsub.f32 1.0, %v826_v0  ;;  %v565_v18 = vmax.f32 %v557_v41, 0.0  ;;  %v427_v45 = vsub.f32 1.0, %v419_v5 }
  0xe8   : > { %v592_v1 = vmul.f32 %v3012_v58, %v564_v30  ;;  %v428_v63 = vsub.f32 1.0, %v420_v52  ;;  %v542_v62 = vsub.f32 %v528_v6, %v2317_v48  ;;  %v543_v33 = vsub.f32 %v528_v6, %v2332_v54  ;;  %1087 = vmatpush.msra.mxu1 %v1086_v32  ;;  %1158 = vmatpush.msra.mxu2 %v2435_v44  ;;  %v2454_v35 = vpop.permute.xlu2 %1967 }
  0xe9   : > { %v841_v51 = vmax.f32 %v833_v36, 0.0  ;;  %v842_v25 = vmax.f32 %v834_v17, 0.0  ;;  %v3013_v22 = vunpack.i.l.bf16 %v2271_v31  ;;  %v3014_v17 = vmov %v3012_v58 }
  0xea   : > { %v669_v37 = vpop.permute.xlu1 %668  ;;  %v593_v5 = vmul.f32 %v3014_v17, %v565_v18  ;;  %v3015_v29 = vunpack.i.h.bf16 %v2271_v31  ;;  %v3017_v36 = vand.u32 4294901760, %v2204_v60  ;;  %v600_v52 = vadd.f32 %v592_v1, %v461_v24 }
  0xeb   : > { %v739_v0 = vmul.f32 %v3013_v22, %v711_v40  ;;  %v435_v6 = vmax.f32 %v427_v45, 0.0  ;;  %v550_v32 = vand.u32 2147483647, %v542_v62  ;;  %v551_v58 = vand.u32 2147483647, %v543_v33 }
  0xec   : > { %v869_v26 = vmul.f32 %v3015_v29, %v841_v51  ;;  %v3016_v41 = vmov %v3015_v29  ;;  %1240 = vmatpush.msrb.mxu0 %v3017_v36  ;;  %v601_v28 = vadd.f32 %v593_v5, %v462_v39  ;;  %v436_v7 = vmax.f32 %v428_v63, 0.0 }
  0xed   : > { %v870_v30 = vmul.f32 %v3016_v41, %v842_v25  ;;  %v3018_v18 = vand.u32 4294901760, %v2207_v61  ;;  %v1957_v51 = vunpack.i.l.bf16 %v2322_v49  ;;  %v558_v31 = vsub.f32 1.0, %v550_v32 }
  0xee   : > { %v877_v40 = vadd.f32 %v869_v26, %v738_v23  ;;  %v559_v25 = vsub.f32 1.0, %v551_v58  ;;  %v688_v60 = vsub.f32 %v669_v37, %v2334_v55  ;;  %v1963_v24 = vunpack.i.h.bf16 %v2386_v34  ;;  %v805_v26 = vpop.permute.xlu0 %804 }
  0xef   : > { %v878_v22 = vadd.f32 %v870_v30, %v739_v0  ;;  %1244 = vmatpush.msrb.mxu0 %v3018_v18  ;;  %v1962_v45 = vunpack.i.l.bf16 %v2386_v34  ;;  %v689_v62 = vsub.f32 %v669_v37, %v2336_v56  ;;  %v3019_v23 = vand.u32 4294901760, %v2238_v13 }
  0xf0   : > { %v885_v39 = vmul.f32 %v877_v40, %v600_v52  ;;  %v566_v63 = vmax.f32 %v558_v31, 0.0  ;;  %v567_v61 = vmax.f32 %v559_v25, 0.0  ;;  %v696_v33 = vand.u32 2147483647, %v688_v60 }
  0xf1   : > { %v886_v1 = vmul.f32 %v878_v22, %v601_v28  ;;  %1248 = vmatpush.msrb.mxu0 %v3019_v23  ;;  %v463_v17 = vmul.f32 %v1957_v51, %v435_v6  ;;  %v464_v5 = vmul.f32 %v1957_v51, %v436_v7  ;;  %v697_v29 = vand.u32 2147483647, %v689_v62  ;;  %v2483_v62 = vld [vmem:[%s2195_s16 + $0xf8] sm:$0xff] }
  0xf2   : > { %v397_v41 = vpop.permute.xlu1 %396  ;;  %v3020_v30 = vand.u32 4294901760, %v2241_v14  ;;  %v3021_v28 = vunpack.i.h.bf16 %v2322_v49  ;;  %v704_v52 = vsub.f32 1.0, %v696_v33  ;;  %v819_v32 = vsub.f32 %v805_v26, %v2334_v55 }
  0xf3   : > { %v2465_v0 = vmul.f32 0.25, %v886_v1  ;;  %v705_v58 = vsub.f32 1.0, %v697_v29  ;;  %v1970_v6 = vunpack.i.h.bf16 %v2454_v35  ;;  %v820_v40 = vsub.f32 %v805_v26, %v2336_v56  ;;  %v2492_v29 = vpop.permute.xlu2 %1972 }
  0xf4   : > { %1252 = vmatpush.msrb.mxu0 %v3020_v30  ;;  %v594_v37 = vmul.f32 %v3021_v28, %v566_v63  ;;  %v3022_v13 = vmov %v3021_v28  ;;  %v413_v22 = vsub.f32 %v397_v41, %v2317_v48  ;;  %v3023_v14 = vand.u32 4294901760, %v2244_v15 }
  0xf5   : > { %v595_v36 = vmul.f32 %v3022_v13, %v567_v61  ;;  %v1969_v7 = vunpack.i.l.bf16 %v2454_v35  ;;  %v827_v18 = vand.u32 2147483647, %v819_v32  ;;  %v1090_v49 = vand.u32 4294901760, %v2435_v44 }
  0xf6   : > { %1256 = vmatpush.msrb.mxu0 %v3023_v14  ;;  %v893_v51 = vmul.f32 0.25, %v885_v39  ;;  %v712_v31 = vmax.f32 %v704_v52, 0.0  ;;  %v828_v25 = vand.u32 2147483647, %v820_v40  ;;  %v414_v60 = vsub.f32 %v397_v41, %v2332_v54 }
  0xf7   : > { %v421_v1 = vand.u32 2147483647, %v413_v22  ;;  %v3024_v23 = vand.u32 4294901760, %v2249_v16  ;;  %v2488_v63 = vand.u32 4294901760, %v2465_v0  ;;  %v602_v15 = vadd.f32 %v594_v37, %v463_v17 }
  0xf8   : > { %v2490_v61 = vadd.f32 %v595_v36, %v464_v5  ;;  %v835_v33 = vsub.f32 1.0, %v827_v18  ;;  %v713_v39 = vmax.f32 %v705_v58, 0.0  ;;  %v836_v26 = vsub.f32 1.0, %v828_v25  ;;  %v533_v58 = vpop.permute.xlu0 %532 }
  0xf9   : > { %1260 = vmatpush.msrb.mxu0 %v3024_v23  ;;  %v422_v30 = vand.u32 2147483647, %v414_v60  ;;  %v429_v28 = vsub.f32 1.0, %v421_v1  ;;  %v3025_v41 = vand.u32 4294901760, %v2283_v38  ;;  %v1091_v16 = vsub.f32 %v2435_v44, %v1090_v49  ;;  %v2613_v44 = vld [vmem:[%s2195_s16 + $0xd8] sm:$0xff] }
  0xfa   : > { %v843_v13 = vmax.f32 %v835_v33, 0.0  ;;  %v2499_v52 = vand.u32 4294901760, %v893_v51  ;;  %v2502_v17 = vand.u32 4294901760, %v2483_v62  ;;  %v740_v5 = vmul.f32 %v1962_v45, %v712_v31  ;;  %v674_v38 = vpop.permute.xlu1 %673 }
  0xfb   : > { %1264 = vmatpush.msrb.mxu0 %v3025_v41  ;;  %v844_v37 = vmax.f32 %v836_v26, 0.0  ;;  %v430_v36 = vsub.f32 1.0, %v422_v30  ;;  %v1975_v32 = vunpack.i.h.bf16 %v2492_v29  ;;  %v3026_v40 = vand.u32 4294901760, %v2296_v43 }
  0xfc   : > { %v871_v22 = vmul.f32 %v1963_v24, %v843_v13  ;;  %v1092_v14 = vand.u32 4294901760, %v1091_v16  ;;  %v966_v18 = vsub.f32 %v893_v51, %v2499_v52  ;;  %v544_v25 = vsub.f32 %v533_v58, %v2317_v48  ;;  %1368 = vmatpush.msrb.mxu2 %v2502_v17  ;;  %v931_v13 = vld [vmem:[%s2195_s16 + $0xf0] sm:$0xff] }
  0xfd   : > { %1268 = vmatpush.msrb.mxu0 %v3026_v40  ;;  %v872_v60 = vmul.f32 %v1963_v24, %v844_v37  ;;  %v437_v31 = vmax.f32 %v429_v28, 0.0  ;;  %v1974_v1 = vunpack.i.l.bf16 %v2492_v29  ;;  %v545_v23 = vsub.f32 %v533_v58, %v2332_v54 }
  0xfe   : > { %v3027_v33 = vand.u32 4294901760, %v2312_v46  ;;  %v879_v43 = vadd.f32 %v871_v22, %v740_v5  ;;  %1093 = vmatpush.msra.mxu1 %v1092_v14  ;;  %1161 = vmatmul.f32.vlgmr.msra.gmra.mxu2 %v966_v18  ;;  %v967_v26 = vand.u32 4294901760, %v966_v18  ;;  %v552_v30 = vand.u32 2147483647, %v544_v25 }
  0xff   : > { %v690_v51 = vsub.f32 %v674_v38, %v2334_v55  ;;  %v741_v41 = vmul.f32 %v1962_v45, %v713_v39  ;;  %1095 = vmatmul.f32.vlgmr.msra.gmra.mxu1 %v2499_v52  ;;  %v553_v24 = vand.u32 2147483647, %v545_v23  ;;  %v691_v28 = vsub.f32 %v674_v38, %v2336_v56 }
 0x100   : > { %1272 = vmatpush.msrb.mxu0 %v3027_v33  ;;  %v3028_v16 = vand.u32 4294901760, %v2329_v53  ;;  %v2526_v46 = vsub.f32 %v2465_v0, %v2488_v63  ;;  %v887_v5 = vmul.f32 %v879_v43, %v602_v15  ;;  %v438_v37 = vmax.f32 %v430_v36, 0.0  ;;  %1215 = vmatmul.f32.vlgmr.msra.gmra.mxu3 %v967_v26  ;;  %v2535_v15 = vpop.permute.xlu2 %1982 }
 0x101   : > { %v560_v58 = vsub.f32 1.0, %v552_v30  ;;  %v698_v40 = vand.u32 2147483647, %v690_v51  ;;  %1319 = vmatpush.msrb.mxu1 %v2199_v59  ;;  %v465_v34 = vmul.f32 %v1969_v7, %v437_v31  ;;  %v561_v45 = vsub.f32 1.0, %v553_v24  ;;  %v810_v31 = vpop.permute.xlu0 %809 }
 0x102   : > { %1276 = vmatpush.msrb.mxu0 %v3028_v16  ;;  %v699_v39 = vand.u32 2147483647, %v691_v28  ;;  %v968_v38 = vsub.f32 %v966_v18, %v967_v26  ;;  %v3029_v53 = vand.u32 4294901760, %v2351_v4  ;;  %v2533_v22 = vadd.f32 %v872_v60, %v741_v41  ;;  %v402_v33 = vpop.permute.xlu1 %401 }
 0x103   : > { %v568_v0 = vmax.f32 %v560_v58, 0.0  ;;  %v706_v14 = vsub.f32 1.0, %v698_v40  ;;  %1321 = vmatpush.msrb.mxu1 %v2201_v42  ;;  %v2538_v36 = vand.u32 4294901760, %v931_v13  ;;  %v569_v59 = vmax.f32 %v561_v45, 0.0 }
 0x104   : > { %1280 = vmatpush.msrb.mxu0 %v3029_v53  ;;  %v707_v25 = vsub.f32 1.0, %v699_v39  ;;  %v969_v23 = vand.u32 4294901760, %v968_v38  ;;  %v2542_v18 = vsub.f32 %v2483_v62, %v2502_v17  ;;  %v3030_v4 = vand.u32 4294901760, %v2361_v27  ;;  %v2571_v38 = vld [vmem:[%s2195_s16 + $0xe0] sm:$0xff] }
 0x105   : > { %v596_v60 = vmul.f32 %v1970_v6, %v568_v0  ;;  %v821_v42 = vsub.f32 %v810_v31, %v2334_v55  ;;  %v822_v43 = vsub.f32 %v810_v31, %v2336_v56  ;;  %v895_v26 = vmul.f32 0.25, %v887_v5  ;;  %1323 = vmatpush.msrb.mxu1 %v2228_v8  ;;  %1370 = vmatpush.msrb.mxu2 %v2538_v36  ;;  %v930_v8 = vld [vmem:[%s2195_s16 + $0xe8] sm:$0xff] }
 0x106   : > { %1284 = vmatpush.msrb.mxu0 %v3030_v4  ;;  %v466_v62 = vmul.f32 %v1969_v7, %v438_v37  ;;  %v597_v27 = vmul.f32 %v1970_v6, %v569_v59  ;;  %v714_v30 = vmax.f32 %v706_v14, 0.0  ;;  %v415_v51 = vsub.f32 %v402_v33, %v2317_v48 }
 0x107   : > { %970 = vmatmul.f32.vlgmr.msra.gmra.mxu0 %v969_v23  ;;  %v1985_v41 = vunpack.i.h.bf16 %v2535_v15  ;;  %v1984_v24 = vunpack.i.l.bf16 %v2535_v15  ;;  %v829_v28 = vand.u32 2147483647, %v821_v42  ;;  %v830_v16 = vand.u32 2147483647, %v822_v43  ;;  %1325 = vmatpush.msrb.mxu1 %v2230_v9 }
 0x108   : > { %v3031_v5 = vand.u32 4294901760, %v2381_v50  ;;  %v604_v7 = vadd.f32 %v596_v60, %v465_v34  ;;  %v715_v35 = vmax.f32 %v707_v25, 0.0  ;;  %v416_v6 = vsub.f32 %v402_v33, %v2332_v54 }
 0x109   : > { %v2564_v37 = vand.u32 2147483647, %v415_v51  ;;  %v837_v58 = vsub.f32 1.0, %v829_v28  ;;  %v838_v40 = vsub.f32 1.0, %v830_v16  ;;  %v2566_v45 = vand.u32 4294901760, %v895_v26  ;;  %1327 = vmatpush.msrb.mxu1 %v2232_v10  ;;  %v538_v33 = vpop.permute.xlu0 %537 }
 0x10a   : > { %1288 = vmatpush.msrb.mxu0 %v3031_v5  ;;  %v1434_v39 = vand.u32 4294901760, %v2542_v18  ;;  %v3032_v9 = vand.u32 4294901760, %v2389_v11  ;;  %v2575_v50 = vadd.f32 %v597_v27, %v466_v62  ;;  %v742_v34 = vmul.f32 %v1974_v1, %v714_v30 }
 0x10b   : > { %v2579_v53 = vand.u32 4294901760, %v930_v8  ;;  %v2582_v0 = vsub.f32 %v931_v13, %v2538_v36  ;;  %v845_v14 = vmax.f32 %v837_v58, 0.0  ;;  %v846_v59 = vmax.f32 %v838_v40, 0.0  ;;  %1099 = vmatmul.f32.gmra.mxu1 %v2566_v45  ;;  %v679_v13 = vpop.permute.xlu1 %678 }
 0x10c   : > { %1292 = vmatpush.msrb.mxu0 %v3032_v9  ;;  %v974_v10 = vsub.f32 %v895_v26, %v2566_v45  ;;  %v1435_v11 = vsub.f32 %v2542_v18, %v1434_v39  ;;  %v3033_v25 = vand.u32 4294901760, %v2414_v2  ;;  %v743_v23 = vmul.f32 %v1974_v1, %v715_v35  ;;  %1329 = vmatpush.msrb.mxu1 %v2235_v12 }
 0x10d   : > { %v424_v31 = vand.u32 2147483647, %v416_v6  ;;  %1372 = vmatpush.msrb.mxu2 %v2579_v53  ;;  %v1440_v4 = vand.u32 4294901760, %v2582_v0  ;;  %v2596_v60 = vand.u32 4294901760, %v2571_v38  ;;  %v873_v42 = vmul.f32 %v1975_v32, %v845_v14 }
 0x10e   : > { %1296 = vmatpush.msrb.mxu0 %v3033_v25  ;;  %v431_v2 = vsub.f32 1.0, %v2564_v37  ;;  %1166 = vmatmul.f32.gmra.mxu2 %v974_v10  ;;  %v975_v1 = vand.u32 4294901760, %v974_v10  ;;  %v546_v43 = vsub.f32 %v538_v33, %v2317_v48  ;;  %v547_v26 = vsub.f32 %v538_v33, %v2332_v54 }
 0x10f   : > { %v692_v62 = vsub.f32 %v679_v13, %v2334_v55  ;;  %v693_v27 = vsub.f32 %v679_v13, %v2336_v56  ;;  %v1436_v12 = vand.u32 4294901760, %v1435_v11  ;;  %1374 = vmatpush.msrb.mxu2 %v2596_v60  ;;  %1331 = vmatpush.msrb.mxu1 %v2277_v19  ;;  %v874_v30 = vmul.f32 %v1975_v32, %v846_v59 }
 0x110   : > { %1300 = vmatpush.msrb.mxu0 %v1090_v49  ;;  %v881_v51 = vadd.f32 %v873_v42, %v742_v34  ;;  %1221 = vmatmul.f32.gmra.mxu3 %v975_v1  ;;  %v554_v48 = vand.u32 2147483647, %v546_v43  ;;  %v976_v28 = vsub.f32 %v974_v10, %v975_v1  ;;  %v555_v54 = vand.u32 2147483647, %v547_v26 }
 0x111   : > { %v700_v49 = vand.u32 2147483647, %v692_v62  ;;  %v701_v16 = vand.u32 2147483647, %v693_v27  ;;  %1437 = vmatpush.msrb.mxu3 %v1436_v12  ;;  %v1441_v5 = vsub.f32 %v2582_v0, %v1440_v4  ;;  %1333 = vmatpush.msrb.mxu1 %v2286_v20  ;;  %v432_v29 = vsub.f32 1.0, %v424_v31  ;;  %v815_v11 = vpop.permute.xlu0 %814  ;;  %v926_v12 = vld [vmem:[%s2195_s16 + $0xc8] sm:$0xff] }
 0x112   : > { %1547 = vmatpush.msra.mxu0 %v2542_v18  ;;  %v889_v19 = vmul.f32 %v881_v51, %v604_v7  ;;  %v977_v32 = vand.u32 4294901760, %v976_v28  ;;  %v2621_v35 = vsub.f32 %v930_v8, %v2579_v53  ;;  %v562_v6 = vsub.f32 1.0, %v554_v48 }
 0x113   : > { %v708_v37 = vsub.f32 1.0, %v700_v49  ;;  %v709_v58 = vsub.f32 1.0, %v701_v16  ;;  %v1442_v40 = vand.u32 4294901760, %v1441_v5  ;;  %1335 = vmatpush.msrb.mxu1 %v2299_v21  ;;  %v563_v9 = vsub.f32 1.0, %v555_v54  ;;  %v2631_v25 = vpop.permute.xlu1 %1977  ;;  %v925_v54 = vld [vmem:[%s2195_s16 + $0xc0] sm:$0xff] }
 0x114   : > { %1550 = vmatpush.msra.mxu0 %v2582_v0  ;;  %v897_v34 = vmul.f32 0.25, %v889_v19  ;;  %v1446_v14 = vand.u32 4294901760, %v2621_v35  ;;  %v2627_v20 = vand.u32 4294901760, %v2613_v44  ;;  %v2629_v7 = vadd.f32 %v874_v30, %v743_v23 }
 0x115   : > { %978 = vmatmul.f32.gmra.mxu0 %v977_v32  ;;  %v439_v8 = vmax.f32 %v431_v2, 0.0  ;;  %v716_v59 = vmax.f32 %v708_v37, 0.0  ;;  %v717_v10 = vmax.f32 %v709_v58, 0.0  ;;  %1443 = vmatpush.msrb.mxu3 %v1442_v40  ;;  %v2634_v21 = vmax.f32 %v432_v29, 0.0  ;;  %v3034_v37 = vld [vmem:[#allocation8_spill] sm:$0xff] }
 0x116   : > { %1337 = vmatpush.msrb.mxu1 %v2315_v47  ;;  %v823_v31 = vsub.f32 %v815_v11, %v2334_v55  ;;  %v824_v33 = vsub.f32 %v815_v11, %v2336_v56  ;;  %1376 = vmatpush.msrb.mxu2 %v2627_v20  ;;  %v2641_v23 = vsub.f32 %v2571_v38, %v2596_v60  ;;  %v570_v13 = vmax.f32 %v562_v6, 0.0  ;;  %v927_v55 = vld [vmem:[%s2195_s16 + $0xd0] sm:$0xff]  ;;  %v924_v6 = vld [vmem:[%s2195_s16 + $0xb8] sm:$0xff] }
 0x117   : > { %1553 = vmatpush.msra.mxu0 %v2621_v35  ;;  %v1980_v42 = vunpack.i.h.bf16 %v2631_v25  ;;  %v2645_v2 = vand.u32 4294901760, %v897_v34  ;;  %v1447_v47 = vsub.f32 %v2621_v35, %v1446_v14  ;;  %v571_v56 = vmax.f32 %v563_v9, 0.0  ;;  %v923_v11 = vld [vmem:[%s2195_s16 + $0xb0] sm:$0xff] }
 0x118   : > { %1339 = vmatpush.msrb.mxu1 %v2338_v57  ;;  %v831_v1 = vand.u32 2147483647, %v823_v31  ;;  %v832_v38 = vand.u32 2147483647, %v824_v33  ;;  %v1979_v43 = vunpack.i.l.bf16 %v2631_v25  ;;  %v744_v26 = vmul.f32 %v1984_v24, %v716_v59  ;;  %v3035_v31 = vld [vmem:[#allocation9_spill] sm:$0xff] }
 0x119   : > { %1556 = vmatpush.msra.mxu0 %v2641_v23  ;;  %v2658_v62 = vmul.f32 %v1984_v24, %v717_v10  ;;  %1103 = vmatmul.f32.gmra.mxu1 %v2645_v2  ;;  %v1448_v27 = vand.u32 4294901760, %v1447_v47  ;;  %v982_v57 = vsub.f32 %v897_v34, %v2645_v2  ;;  %v1452_v48 = vand.u32 4294901760, %v2641_v23 }
 0x11a   : > { %v839_v30 = vsub.f32 1.0, %v831_v1  ;;  %v840_v51 = vsub.f32 1.0, %v832_v38  ;;  %v2664_v28 = vand.u32 4294901760, %v927_v55  ;;  %1341 = vmatpush.msrb.mxu1 %v2348_v3  ;;  %v598_v49 = vmul.f32 %v1980_v42, %v570_v13 }
 0x11b   : > { %v2668_v16 = vmul.f32 %v1980_v42, %v571_v56  ;;  %1449 = vmatpush.msrb.mxu3 %v1448_v27  ;;  %1171 = vmatmul.f32.gmra.mxu2 %v982_v57  ;;  %v983_v24 = vand.u32 4294901760, %v982_v57  ;;  %v2672_v5 = vsub.f32 %v2613_v44, %v2627_v20  ;;  %v467_v29 = vmul.f32 %v1979_v43, %v439_v8  ;;  %v922_v27 = vld [vmem:[%s2195_s16 + $0xa8] sm:$0xff] }
 0x11c   : > { %v847_v19 = vmax.f32 %v839_v30, 0.0  ;;  %v1453_v32 = vsub.f32 %v2641_v23, %v1452_v48  ;;  %1378 = vmatpush.msrb.mxu2 %v2664_v28  ;;  %v2680_v3 = vand.u32 4294901760, %v926_v12  ;;  %1343 = vmatpush.msrb.mxu1 %v3034_v37  ;;  %v2686_v58 = vsub.f32 %v927_v55, %v2664_v28 }
 0x11d   : > { %1227 = vmatmul.f32.gmra.mxu3 %v983_v24  ;;  %v1458_v44 = vand.u32 4294901760, %v2672_v5  ;;  %v984_v40 = vsub.f32 %v982_v57, %v983_v24  ;;  %v2688_v9 = vand.u32 4294901760, %v925_v54  ;;  %1559 = vmatpush.msra.mxu0 %v2672_v5  ;;  %v848_v34 = vmax.f32 %v840_v51, 0.0  ;;  %v3036_v51 = vld [vmem:[#allocation10_spill] sm:$0xff] }
 0x11e   : > { %v875_v8 = vmul.f32 %v1985_v41, %v847_v19  ;;  %v1454_v59 = vand.u32 4294901760, %v1453_v32  ;;  %1380 = vmatpush.msrb.mxu2 %v2680_v3  ;;  %v2695_v10 = vsub.f32 %v926_v12, %v2680_v3  ;;  %1345 = vmatpush.msrb.mxu1 %v3035_v31  ;;  %v3003_v13 = vand.u32 4294901760, %v2686_v58 }
 0x11f   : > { %v1459_v33 = vsub.f32 %v2672_v5, %v1458_v44  ;;  %v985_v42 = vand.u32 4294901760, %v984_v40  ;;  %v2703_v47 = vand.u32 4294901760, %v924_v6  ;;  %1562 = vmatpush.msra.mxu0 %v2686_v58  ;;  %v606_v56 = vadd.f32 %v598_v49, %v467_v29  ;;  %v921_v29 = vld [vmem:[%s2195_s16 + $0xa0] sm:$0xff]  ;;  %v3037_v40 = vld [vmem:[#allocation11_spill] sm:$0xff] }
 0x120   : > { %v883_v55 = vadd.f32 %v875_v8, %v744_v26  ;;  %1455 = vmatpush.msrb.mxu3 %v1454_v59  ;;  %1382 = vmatpush.msrb.mxu2 %v2688_v9  ;;  %v3002_v1 = vand.u32 4294901760, %v2695_v10  ;;  %v2709_v38 = vsub.f32 %v925_v54, %v2688_v9  ;;  %v1465_v12 = vsub.f32 %v2686_v58, %v3003_v13 }
 0x121   : > { %v1460_v57 = vand.u32 4294901760, %v1459_v33  ;;  %986 = vmatmul.f32.gmra.mxu0 %v985_v42  ;;  %v2715_v30 = vand.u32 4294901760, %v923_v11  ;;  %v2718_v26 = vsub.f32 %v924_v6, %v2703_v47  ;;  %1347 = vmatpush.msrb.mxu1 %v3036_v51  ;;  %v876_v49 = vmul.f32 %v1985_v41, %v848_v34  ;;  %v920_v41 = vld [vmem:[%s2195_s16 + $0x98] sm:$0xff]  ;;  %v919_v33 = vld [vmem:[%s2195_s16 + $0x90] sm:$0xff]  ;;  %v918_v42 = vld [vmem:[%s2195_s16 + $0x88] sm:$0xff] }
 0x122   : > { %v891_v54 = vmul.f32 %v883_v55, %v606_v56  ;;  %v1471_v24 = vsub.f32 %v2695_v10, %v3002_v1  ;;  %1384 = vmatpush.msrb.mxu2 %v2703_v47  ;;  %v3001_v19 = vand.u32 4294901760, %v2709_v38  ;;  %1565 = vmatpush.msra.mxu0 %v2695_v10  ;;  %v1466_v32 = vand.u32 4294901760, %v1465_v12  ;;  %v917_v51 = vld [vmem:[%s2195_s16 + $0x80] sm:$0xff] }
 0x123   : > { %1461 = vmatpush.msrb.mxu3 %v1460_v57  ;;  %v2999_v6 = vand.u32 4294901760, %v2718_v26  ;;  %v2731_v37 = vand.u32 4294901760, %v922_v27  ;;  %v2734_v15 = vsub.f32 %v923_v11, %v2715_v30  ;;  %1349 = vmatpush.msrb.mxu1 %v3037_v40  ;;  %v2741_v34 = vmul.f32 %v1979_v43, %v2634_v21 }
 0x124   : > { %v899_v8 = vmul.f32 0.25, %v891_v54  ;;  %v1472_v59 = vand.u32 4294901760, %v1471_v24  ;;  %v1477_v31 = vsub.f32 %v2709_v38, %v3001_v19  ;;  %1386 = vmatpush.msrb.mxu2 %v2715_v30  ;;  %v2752_v21 = vand.u32 4294901760, %v921_v29  ;;  %1568 = vmatpush.msra.mxu0 %v2709_v38 }
 0x125   : > { %1615 = vmatpush.msra.mxu1 %v2502_v17  ;;  %1467 = vmatpush.msrb.mxu3 %v1466_v32  ;;  %v1483_v11 = vsub.f32 %v2718_v26, %v2999_v6  ;;  %v2998_v25 = vand.u32 4294901760, %v2734_v15  ;;  %v2755_v43 = vsub.f32 %v922_v27, %v2731_v37  ;;  %v884_v55 = vadd.f32 %v876_v49, %v2658_v62 }
 0x126   : > { %v1478_v56 = vand.u32 4294901760, %v1477_v31  ;;  %1388 = vmatpush.msrb.mxu2 %v2731_v37  ;;  %v2762_v57 = vand.u32 4294901760, %v899_v8  ;;  %v2764_v12 = vand.u32 4294901760, %v920_v41  ;;  %v2773_v62 = vsub.f32 %v921_v29, %v2752_v21  ;;  %1571 = vmatpush.msra.mxu0 %v2718_v26 }
 0x127   : > { %1617 = vmatpush.msra.mxu1 %v2538_v36  ;;  %1473 = vmatpush.msrb.mxu3 %v1472_v59  ;;  %v1484_v54 = vand.u32 4294901760, %v1483_v11  ;;  %v1489_v27 = vsub.f32 %v2734_v15, %v2998_v25  ;;  %v3000_v24 = vand.u32 4294901760, %v2755_v43  ;;  %v2779_v32 = vand.u32 4294901760, %v919_v33 }
 0x128   : > { %1107 = vmatmul.f32.gmra.mxu1 %v2762_v57  ;;  %1390 = vmatpush.msrb.mxu2 %v2752_v21  ;;  %v990_v49 = vsub.f32 %v899_v8, %v2762_v57  ;;  %v2782_v40 = vsub.f32 %v920_v41, %v2764_v12  ;;  %v2784_v59 = vand.u32 4294901760, %v918_v42  ;;  %v3004_v11 = vand.u32 4294901760, %v2773_v62 }
 0x129   : > { %1479 = vmatpush.msrb.mxu3 %v1478_v56  ;;  %v1490_v31 = vand.u32 4294901760, %v1489_v27  ;;  %v1495_v29 = vsub.f32 %v2755_v43, %v3000_v24  ;;  %v2790_v25 = vand.u32 4294901760, %v917_v51  ;;  %1619 = vmatpush.msra.mxu1 %v2579_v53  ;;  %v2795_v41 = vsub.f32 %v919_v33, %v2779_v32 }
 0x12a   : > { %1176 = vmatmul.f32.gmra.mxu2 %v990_v49  ;;  %v991_v8 = vand.u32 4294901760, %v990_v49  ;;  %v3005_v6 = vand.u32 4294901760, %v2782_v40  ;;  %v2798_v56 = vsub.f32 %v918_v42, %v2784_v59  ;;  %1574 = vmatpush.msra.mxu0 %v2734_v15  ;;  %v1501_v24 = vsub.f32 %v2773_v62, %v3004_v11 }
 0x12b   : > { %1485 = vmatpush.msrb.mxu3 %v1484_v54  ;;  %v1496_v27 = vand.u32 4294901760, %v1495_v29  ;;  %1392 = vmatpush.msrb.mxu2 %v2764_v12  ;;  %v3006_v19 = vand.u32 4294901760, %v2526_v46  ;;  %v2807_v1 = vsub.f32 %v917_v51, %v2790_v25  ;;  %v1512_v42 = vand.u32 4294901760, %v2795_v41 }
 0x12c   : > { %1233 = vmatmul.f32.gmra.mxu3 %v991_v8  ;;  %v1507_v33 = vsub.f32 %v2782_v40, %v3005_v6  ;;  %v992_v54 = vsub.f32 %v990_v49, %v991_v8  ;;  %v3007_v29 = vand.u32 4294901760, %v2798_v56  ;;  %1621 = vmatpush.msra.mxu1 %v2596_v60  ;;  %v1502_v13 = vand.u32 4294901760, %v1501_v24 }
 0x12d   : > { %1491 = vmatpush.msrb.mxu3 %v1490_v31  ;;  %1394 = vmatpush.msrb.mxu2 %v2779_v32  ;;  %v1402_v51 = vsub.f32 %v2526_v46, %v3006_v19  ;;  %v1524_v11 = vand.u32 4294901760, %v2807_v1  ;;  %v888_v6 = vmul.f32 %v2533_v22, %v2490_v61  ;;  %v607_v49 = vadd.f32 %v2668_v16, %v2741_v34 }
 0x12e   : > { %v1513_v8 = vsub.f32 %v2795_v41, %v1512_v42  ;;  %v993_v31 = vand.u32 4294901760, %v992_v54  ;;  %1623 = vmatpush.msra.mxu1 %v2627_v20  ;;  %1577 = vmatpush.msra.mxu0 %v2755_v43  ;;  %v1508_v24 = vand.u32 4294901760, %v1507_v33  ;;  %v1519_v61 = vsub.f32 %v2798_v56, %v3007_v29 }
 0x12f   : > { %1497 = vmatpush.msrb.mxu3 %v1496_v27  ;;  %1396 = vmatpush.msrb.mxu2 %v2784_v59  ;;  %v896_v22 = vmul.f32 0.25, %v888_v6  ;;  %v890_v16 = vmul.f32 %v2629_v7, %v2575_v50  ;;  %v892_v34 = vmul.f32 %v884_v55, %v607_v49  ;;  %v1403_v54 = vand.u32 4294901760, %v1402_v51 }
 0x130   : > { %994 = vmatmul.f32.gmra.mxu0 %v993_v31  ;;  %1351 = vmatmul.f32.vlgmr.msrb.gmra.mxu1 %v2499_v52  ;;  %v1514_v19 = vand.u32 4294901760, %v1513_v8  ;;  %v1525_v27 = vsub.f32 %v2807_v1, %v1524_v11  ;;  %v1520_v50 = vand.u32 4294901760, %v1519_v61  ;;  %v3044_v5 = vand.u32 4294901760, %v2773_v62 }
 0x131   : > { %1503 = vmatpush.msrb.mxu3 %v1502_v13  ;;  %1398 = vmatpush.msrb.mxu2 %v2790_v25  ;;  %v2840_v33 = vand.u32 4294901760, %v896_v22  ;;  %v898_v29 = vmul.f32 0.25, %v890_v16  ;;  %v900_v6 = vmul.f32 0.25, %v892_v34 }
 0x132   : > { %1404 = vmatmul.f32.vlgmr.msrb.gmra.mxu2 %v1403_v54  ;;  %1625 = vmatpush.msra.mxu1 %v2664_v28  ;;  %v1526_v55 = vand.u32 4294901760, %v1525_v27 }
 0x133   : > { %1509 = vmatpush.msrb.mxu3 %v1508_v24  ;;  %1674 = vmatpush.msra.mxu2 %v1434_v39  ;;  %v2846_v7 = vsub.f32 %v896_v22, %v2840_v33  ;;  %v2848_v13 = vand.u32 4294901760, %v898_v29  ;;  %v2867_v0 = vand.u32 4294901760, %v900_v6 }
 0x134   : > { %1627 = vmatpush.msra.mxu1 %v2680_v3  ;;  %1580 = vmatpush.msra.mxu0 %v2773_v62 }
 0x135   : > { %1515 = vmatpush.msrb.mxu3 %v1514_v19  ;;  %1678 = vmatpush.msra.mxu2 %v1440_v4  ;;  %v1409_v51 = vand.u32 4294901760, %v2846_v7  ;;  %v2856_v18 = vsub.f32 %v898_v29, %v2848_v13  ;;  %v1424_v35 = vsub.f32 %v900_v6, %v2867_v0 }
 0x136   : > { %1629 = vmatpush.msra.mxu1 %v2688_v9  ;;  %1583 = vmatpush.msra.mxu0 %v2782_v40 }
 0x137   : > { %1521 = vmatpush.msrb.mxu3 %v1520_v50  ;;  %1682 = vmatpush.msra.mxu2 %v1446_v14  ;;  %v1410_v39 = vsub.f32 %v2846_v7, %v1409_v51  ;;  %v1417_v19 = vand.u32 4294901760, %v2856_v18  ;;  %v3038_v14 = vand.u32 4294901760, %v2686_v58  ;;  %v1425_v23 = vand.u32 4294901760, %v1424_v35 }
 0x138   : > { %1302 = vmatmul.f32.vlgmr.msrb.gmra.mxu0 %v2499_v52  ;;  %1355 = vmatmul.f32.gmra.mxu1 %v2566_v45 }
 0x139   : > { %1527 = vmatpush.msrb.mxu3 %v1526_v55  ;;  %1686 = vmatpush.msra.mxu2 %v1452_v48  ;;  %v1411_v4 = vand.u32 4294901760, %v1410_v39  ;;  %v1418_v52 = vsub.f32 %v2856_v18, %v1417_v19  ;;  %v3040_v48 = vand.u32 4294901760, %v2709_v38 }
 0x13a   : > { %1529 = vmatmul.f32.vlgmr.msrb.gmra.mxu3 %v2488_v63  ;;  %1631 = vmatpush.msra.mxu1 %v2703_v47 }
 0x13b   : > { %1753 = vmatpush.msra.mxu3 %v2502_v17  ;;  %1412 = vmatmul.f32.gmra.mxu2 %v1411_v4  ;;  %v3039_v17 = vand.u32 4294901760, %v2695_v10 }
 0x13c   : > { %1690 = vmatpush.msra.mxu2 %v1458_v44  ;;  %1633 = vmatpush.msra.mxu1 %v2715_v30  ;;  %v3047_v44 = vand.u32 4294901760, %v2526_v46 }
 0x13d   : > { %1755 = vmatpush.msra.mxu3 %v2538_v36  ;;  %1586 = vmatpush.msra.mxu0 %v2795_v41  ;;  %v1419_v36 = vand.u32 4294901760, %v1418_v52 }
 0x13e   : > { %1694 = vmatpush.msra.mxu2 %v3038_v14  ;;  %1635 = vmatpush.msra.mxu1 %v2731_v37 }
 0x13f   : > { %1757 = vmatpush.msra.mxu3 %v2579_v53  ;;  %1589 = vmatpush.msra.mxu0 %v2798_v56  ;;  %v3041_v53 = vand.u32 4294901760, %v2718_v26 }
 0x140   : > { %1698 = vmatpush.msra.mxu2 %v3039_v17  ;;  %1306 = vmatmul.f32.gmra.mxu0 %v2566_v45  ;;  %v1426_v45 = vsub.f32 %v1424_v35, %v1425_v23 }
 0x141   : > { %1759 = vmatpush.msra.mxu3 %v2596_v60  ;;  %1359 = vmatmul.f32.gmra.mxu1 %v2645_v2  ;;  %v3042_v60 = vand.u32 4294901760, %v2734_v15 }
 0x142   : > { %1533 = vmatmul.f32.gmra.mxu3 %v2840_v33  ;;  %1702 = vmatpush.msra.mxu2 %v3040_v48 }
 0x143   : > { %1761 = vmatpush.msra.mxu3 %v2627_v20  ;;  %1420 = vmatmul.f32.gmra.mxu2 %v1419_v36  ;;  %v3043_v20 = vand.u32 4294901760, %v2755_v43 }
 0x144   : > { %1706 = vmatpush.msra.mxu2 %v3041_v53  ;;  %1637 = vmatpush.msra.mxu1 %v2752_v21 }
 0x145   : > { %1763 = vmatpush.msra.mxu3 %v2664_v28  ;;  %1592 = vmatpush.msra.mxu0 %v2807_v1  ;;  %v1427_v28 = vand.u32 4294901760, %v1426_v45 }
 0x146   : > { %1710 = vmatpush.msra.mxu2 %v3042_v60  ;;  %1639 = vmatpush.msra.mxu1 %v2764_v12 }
 0x147   : > { %1765 = vmatpush.msra.mxu3 %v2680_v3  ;;  %v3045_v3 = vand.u32 4294901760, %v2782_v40 }
 0x148   : > { %1714 = vmatpush.msra.mxu2 %v3043_v20  ;;  %1310 = vmatmul.f32.gmra.mxu0 %v2645_v2  ;;  %v3046_v2 = vand.u32 4294901760, %v2798_v56 }
 0x149   : > { %1767 = vmatpush.msra.mxu3 %v2688_v9  ;;  %1363 = vmatmul.f32.gmra.mxu1 %v2762_v57 }
 0x14a   : > { %1537 = vmatmul.f32.gmra.mxu3 %v2848_v13  ;;  %1718 = vmatpush.msra.mxu2 %v3044_v5 }
 0x14b   : > { %1769 = vmatpush.msra.mxu3 %v2703_v47  ;;  %1428 = vmatmul.f32.gmra.mxu2 %v1427_v28 }
 0x14c   : > { %1641 = vmatpush.msra.mxu1 %v2779_v32  ;;  %1722 = vmatpush.msra.mxu2 %v3045_v3 }
 0x14d   : > { %1771 = vmatpush.msra.mxu3 %v2715_v30 }
 0x14e   : > { %1643 = vmatpush.msra.mxu1 %v2784_v59  ;;  %1726 = vmatpush.msra.mxu2 %v1512_v42 }
 0x14f   : > { %1773 = vmatpush.msra.mxu3 %v2731_v37 }
 0x150   : > { %1645 = vmatpush.msra.mxu1 %v2790_v25  ;;  %1730 = vmatpush.msra.mxu2 %v3046_v2 }
 0x151   : > { %1775 = vmatpush.msra.mxu3 %v2752_v21  ;;  %1314 = vmatmul.f32.gmra.mxu0 %v2762_v57 }
 0x152   : > { %1541 = vmatmul.f32.gmra.mxu3 %v2867_v0  ;;  %1649 = vmatmul.f32.vlgmr.msra.gmra.mxu1 %v3047_v44 }
 0x153   : > { %1777 = vmatpush.msra.mxu3 %v2764_v12  ;;  %1734 = vmatpush.msra.mxu2 %v1524_v11 }
 0x154   : > { %1736 = vmatmul.f32.vlgmr.msra.gmra.mxu2 %v2488_v63 }
 0x155   : > { %1779 = vmatpush.msra.mxu3 %v2779_v32 }
 0x157   : > { %1781 = vmatpush.msra.mxu3 %v2784_v59 }
 0x159   : > { %1783 = vmatpush.msra.mxu3 %v2790_v25  ;;  %1595 = vmatmul.f32.vlgmr.msra.gmra.mxu0 %v2526_v46 }
 0x15a   : > { %1785 = vmatmul.f32.vlgmr.msra.gmra.mxu3 %v2488_v63  ;;  %1655 = vmatmul.f32.gmra.mxu1 %v1409_v51 }
 0x15c   : > { %1740 = vmatmul.f32.gmra.mxu2 %v2840_v33 }
 0x161   : > { %1600 = vmatmul.f32.gmra.mxu0 %v2846_v7 }
 0x162   : > { %1789 = vmatmul.f32.gmra.mxu3 %v2840_v33  ;;  %1661 = vmatmul.f32.gmra.mxu1 %v1417_v19 }
 0x164   : > { %1744 = vmatmul.f32.gmra.mxu2 %v2848_v13 }
 0x169   : > { %1605 = vmatmul.f32.gmra.mxu0 %v2856_v18 }
 0x16a   : > { %1793 = vmatmul.f32.gmra.mxu3 %v2848_v13  ;;  %1667 = vmatmul.f32.gmra.mxu1 %v1425_v23 }
 0x16c   : > { %1748 = vmatmul.f32.gmra.mxu2 %v2867_v0 }
 0x171   : > { %1610 = vmatmul.f32.gmra.mxu0 %v1424_v35 }
 0x172   : > { %1797 = vmatmul.f32.gmra.mxu3 %v2867_v0 }
 0x17c   : > { %v1096_v63 = vpop.f32.mrf.mxu1 }
 0x181   : > { %v1162_v58 = vpop.f32.mrf.mxu2 }
 0x183   : > { %v1216_v10 = vpop.f32.mrf.mxu3 }
 0x184   : > { %v971_v46 = vpop.f32.mrf.mxu0 }
 0x185   : > { %v1097_v42 = vadd.f32 %v1096_v63, %v971_v46 }
 0x187   : > { %v1163_v29 = vadd.f32 %v1162_v58, %v1097_v42 }
 0x188   : > { %v1100_v9 = vpop.f32.mrf.mxu1 }
 0x189   : > { %v1217_v24 = vadd.f32 %v1216_v10, %v1163_v29 }
 0x191   : > { %v1167_v1 = vpop.f32.mrf.mxu2 }
 0x192   : > { %v979_v47 = vpop.f32.mrf.mxu0 }
 0x193   : > { %v1222_v30 = vpop.f32.mrf.mxu3  ;;  %v1101_v61 = vadd.f32 %v1100_v9, %v979_v47 }
 0x195   : > { %v1168_v34 = vadd.f32 %v1167_v1, %v1101_v61 }
 0x196   : > { %v1104_v38 = vpop.f32.mrf.mxu1 }
 0x197   : > { %v1223_v7 = vadd.f32 %v1222_v30, %v1168_v34 }
 0x19e   : > { %v987_v26 = vpop.f32.mrf.mxu0  ;;  %v1172_v37 = vpop.f32.mrf.mxu2 }
 0x19f   : > { %v1105_v13 = vadd.f32 %v1104_v38, %v987_v26 }
 0x1a0   : > { %v1228_v25 = vpop.f32.mrf.mxu3 }
 0x1a1   : > { %v1173_v18 = vadd.f32 %v1172_v37, %v1105_v13 }
 0x1a3   : > { %v1229_v52 = vadd.f32 %v1228_v25, %v1173_v18 }
 0x1a5   : > { %v1108_v15 = vpop.f32.mrf.mxu1 }
 0x1ad   : > { %v995_v21 = vpop.f32.mrf.mxu0  ;;  %v1177_v43 = vpop.f32.mrf.mxu2 }
 0x1ae   : > { %v1352_v57 = vpop.f32.mrf.mxu1  ;;  %v1109_v35 = vadd.f32 %v1108_v15, %v995_v21 }
 0x1af   : > { %v1234_v12 = vpop.f32.mrf.mxu3 }
 0x1b0   : > { %v1178_v53 = vadd.f32 %v1177_v43, %v1109_v35 }
 0x1b2   : > { %v1235_v44 = vadd.f32 %v1234_v12, %v1178_v53 }
 0x1b5   : > { %v1303_v62 = vpop.f32.mrf.mxu0  ;;  %v1405_v32 = vpop.f32.mrf.mxu2 }
 0x1b6   : > { %v1356_v40 = vpop.f32.mrf.mxu1  ;;  %v1304_v16 = vadd.f32 %v1303_v62, %v1217_v24 }
 0x1b8   : > { %v1353_v54 = vadd.f32 %v1352_v57, %v1304_v16 }
 0x1ba   : > { %v1406_v6 = vadd.f32 %v1405_v32, %v1353_v54 }
 0x1bd   : > { %v1530_v59 = vpop.f32.mrf.mxu3  ;;  %v1307_v11 = vpop.f32.mrf.mxu0 }
 0x1be   : > { %v1360_v41 = vpop.f32.mrf.mxu1  ;;  %v1413_v56 = vpop.f32.mrf.mxu2  ;;  %v1308_v55 = vadd.f32 %v1307_v11, %v1223_v7  ;;  %v1531_v39 = vadd.f32 %v1530_v59, %v1406_v6 }
 0x1c0   : > { %v1357_v0 = vadd.f32 %v1356_v40, %v1308_v55 }
 0x1c2   : > { %v1414_v36 = vadd.f32 %v1413_v56, %v1357_v0 }
 0x1c5   : > { %v1534_v49 = vpop.f32.mrf.mxu3  ;;  %v1311_v8 = vpop.f32.mrf.mxu0 }
 0x1c6   : > { %v1421_v31 = vpop.f32.mrf.mxu2  ;;  %v1364_v22 = vpop.f32.mrf.mxu1  ;;  %v1312_v23 = vadd.f32 %v1311_v8, %v1229_v52  ;;  %v1535_v20 = vadd.f32 %v1534_v49, %v1414_v36 }
 0x1c8   : > { %v1361_v28 = vadd.f32 %v1360_v41, %v1312_v23 }
 0x1ca   : > { %v1422_v58 = vadd.f32 %v1421_v31, %v1361_v28 }
 0x1cd   : > { %v1538_v27 = vpop.f32.mrf.mxu3 }
 0x1ce   : > { %v1315_v33 = vpop.f32.mrf.mxu0  ;;  %v1429_v50 = vpop.f32.mrf.mxu2  ;;  %v1539_v1 = vadd.f32 %v1538_v27, %v1422_v58 }
 0x1cf   : > { %v1650_v51 = vpop.f32.mrf.mxu1  ;;  %v1316_v9 = vadd.f32 %v1315_v33, %v1235_v44 }
 0x1d1   : > { %v1365_v38 = vadd.f32 %v1364_v22, %v1316_v9 }
 0x1d3   : > { %v1430_v43 = vadd.f32 %v1429_v50, %v1365_v38 }
 0x1d5   : > { %v1542_v4 = vpop.f32.mrf.mxu3 }
 0x1d6   : > { %v1596_v19 = vpop.f32.mrf.mxu0  ;;  %v1543_v62 = vadd.f32 %v1542_v4, %v1430_v43 }
 0x1d7   : > { %v1597_v14 = vadd.f32 %v1596_v19, %v1531_v39  ;;  %v1737_v17 = vpop.f32.mrf.mxu2  ;;  %v1656_v60 = vpop.f32.mrf.mxu1 }
 0x1d9   : > { %v1651_v48 = vadd.f32 %v1650_v51, %v1597_v14 }
 0x1db   : > { %v1738_v45 = vadd.f32 %v1737_v17, %v1651_v48 }
 0x1dd   : > { %v1786_v5 = vpop.f32.mrf.mxu3 }
 0x1de   : > { %v1787_v3 = vadd.f32 %v1786_v5, %v1738_v45  ;;  %v1601_v2 = vpop.f32.mrf.mxu0 }
 0x1df   : > { %v1602_v63 = vadd.f32 %v1601_v2, %v1535_v20  ;;  %v1741_v46 = vpop.f32.mrf.mxu2  ;;  %v1662_v26 = vpop.f32.mrf.mxu1 }
 0x1e0   : > { %1802 = vst.msk [vmem:[%s2958_s24] sm:$0xff] %vm1801_vm2, %v1787_v3 }
 0x1e1   : > { %v1657_v10 = vadd.f32 %v1656_v60, %v1602_v63 }
 0x1e3   : > { %v1742_v47 = vadd.f32 %v1741_v46, %v1657_v10 }
 0x1e5   : > { %v1790_v30 = vpop.f32.mrf.mxu3 }
 0x1e6   : > { %v1791_v37 = vadd.f32 %v1790_v30, %v1742_v47  ;;  %v1606_v15 = vpop.f32.mrf.mxu0 }
 0x1e7   : > { %v1607_v25 = vadd.f32 %v1606_v15, %v1539_v1  ;;  %v1745_v21 = vpop.f32.mrf.mxu2  ;;  %v1668_v41 = vpop.f32.mrf.mxu1 }
 0x1e8   : > { %1803 = vst.msk [vmem:[%s2958_s24 + $0x8] sm:$0xff] %vm1801_vm2, %v1791_v37 }
 0x1e9   : > { %v1663_v57 = vadd.f32 %v1662_v26, %v1607_v25 }
 0x1eb   : > { %v1746_v12 = vadd.f32 %v1745_v21, %v1663_v57 }
 0x1ed   : > { %v1794_v32 = vpop.f32.mrf.mxu3 }
 0x1ee   : > { %v1795_v40 = vadd.f32 %v1794_v32, %v1746_v12  ;;  %v1611_v59 = vpop.f32.mrf.mxu0 }
 0x1ef   : > { %v1612_v11 = vadd.f32 %v1611_v59, %v1543_v62  ;;  %v1749_v42 = vpop.f32.mrf.mxu2 }
 0x1f0   : > { %1804 = vst.msk [vmem:[%s2958_s24 + $0x10] sm:$0xff] %vm1801_vm2, %v1795_v40 }
 0x1f1   : > { %v1669_v56 = vadd.f32 %v1668_v41, %v1612_v11 }
 0x1f3   : > { %v1750_v29 = vadd.f32 %v1749_v42, %v1669_v56 }
 0x1f5   : > { %v1798_v49 = vpop.f32.mrf.mxu3 }
 0x1f6   : > { %v1799_v8 = vadd.f32 %v1798_v49, %v1750_v29 }
 0x1f8   : > { %1806 = vst.msk [vmem:[%s2958_s24 + $0x18] sm:$0x1] %vm1805_vm3, %v1799_v8 }
 0x1f9 PF: > { %s26_s28 = sadd.s32 1, %s2029_s28  }
 0x1fa   : > { %p23_p8 = scmp.ge.s32.totalorder %s26_s28, 6  }
 0x1fc   :  { %25 = sbr.rel (!%p23_p8) target bundleno = 7 (0x7), region = 79 }
 0x201   :  { %1828 = vsyncpa [#allocation5], 1 }
 0x202   :  { %1830 = vsyncpa [#allocation5 + $0x1], 1 }

</bundles_post_ra>
